<compile_context>
chip_gen: v6e
topology: v6e:2x2x1
jax: 0.10.0
libtpu: 0.0.40
codegen_flags: <defaults>
</compile_context>

<pallas_src>
import functools

import jax
import jax.numpy as jnp
from jax.experimental import pallas as pl
from jax.experimental.pallas import tpu as pltpu

BN_EPS = 1e-5        # PyTorch BatchNorm1d default eps
LANE = 128           # padded feature width for the small (20/10-wide) layers
L1_OUT = 1024
IN_FEATURES = 784
TILE1 = 512          # layer-1 output-column tile width -> grid of 2 steps


def _activate(h, a_type):
    if a_type == "relu":
        return jnp.maximum(h, 0.0)
    if a_type == "tanh":
        return jnp.tanh(h)
    if a_type == "sigmoid":
        return jax.nn.sigmoid(h)
    if a_type == "leaky_relu":
        return jnp.where(h >= 0.0, h, 0.01 * h)   # PyTorch default slope 0.01
    if a_type is None:
        return h
    raise NotImplementedError(a_type)


def _bn_train(a, gamma, beta):
    # Training-mode BatchNorm1d: batch mean + biased batch variance (two-pass form,
    # matching PyTorch; one extra cross-sublane reduce is negligible at these sizes).
    mean = jnp.mean(a, axis=0, keepdims=True)
    var = jnp.mean(jnp.square(a - mean), axis=0, keepdims=True)
    return gamma * (a - mean) * jax.lax.rsqrt(var + BN_EPS) + beta


def fc_hero_kernel(x_ref, w1_ref, bgb1_ref, w2_ref, w345_ref, sp_ref,
                   o1_ref, o2345_ref, *, a_type):
    j = pl.program_id(0)
    tile1 = w1_ref.shape[1]
    off = pl.multiple_of(j * tile1, tile1)

    # ------------- layer 1: one 512-wide output tile per grid step -------------
    # Native bf16 x bf16 -> f32 MXU path; no materialized f32 copy of the W1 tile.
    h = jnp.dot(x_ref[...], w1_ref[...], preferred_element_type=jnp.float32)
    bgb = bgb1_ref[:, pl.ds(off, tile1)]                 # resident slab, sliced here
    a = _activate(h + bgb[0:1, :], a_type)
    a = _bn_train(a, bgb[1:2, :], bgb[2:3, :])
    # Resident output doubles as the layer-1 accumulator (no separate scratch).
    o1_ref[:, pl.ds(off, tile1)] = a

    # ------------- layers 2..5: once, after the last layer-1 tile ---------------
    @pl.when(j == pl.num_programs(0) - 1)
    def _():
        sp = sp_ref[...]                                 # (4, 3, 128) f32
        w345 = w345_ref[...]                             # (3, 128, 128) bf16

        l1 = o1_ref[...].astype(jnp.bfloat16)            # (N, 1024) -> bf16 feed
        h2 = jnp.dot(l1, w2_ref[...], preferred_element_type=jnp.float32)
        a2 = _bn_train(_activate(h2 + sp[0, 0:1, :], a_type),
                       sp[0, 1:2, :], sp[0, 2:3, :])

        h3 = jnp.dot(a2.astype(jnp.bfloat16), w345[0],
                     preferred_element_type=jnp.float32)
        a3 = _bn_train(_activate(h3 + sp[1, 0:1, :], a_type),
                       sp[1, 1:2, :], sp[1, 2:3, :])

        h4 = jnp.dot(a3.astype(jnp.bfloat16), w345[1],
                     preferred_element_type=jnp.float32)
        a4 = _bn_train(_activate(h4 + sp[2, 0:1, :], a_type),
                       sp[2, 1:2, :], sp[2, 2:3, :])

        # layer 5: plain Linear (no activation, no BN)
        h5 = jnp.dot(a4.astype(jnp.bfloat16), w345[2],
                     preferred_element_type=jnp.float32) + sp[3, 0:1, :]

        o2345_ref[0] = a2
        o2345_ref[1] = a3
        o2345_ref[2] = a4
        o2345_ref[3] = h5


def _pad_mat(w, rows, cols):
    return jnp.zeros((rows, cols), jnp.float32).at[:w.shape[0], :w.shape[1]].set(
        w.astype(jnp.float32))


def _pad_vec(v, n):
    return jnp.zeros((n,), jnp.float32).at[:v.shape[0]].set(v.astype(jnp.float32))


def pack_params(params):
    """Pack/pad parameters ONCE (hoisted out of the per-call forward path)."""
    (w1, b1, g1, be1) = params[0]
    (w2, b2, g2, be2) = params[1]
    (w3, b3, g3, be3) = params[2]
    (w4, b4, g4, be4) = params[3]
    (w5, b5, _g5, _be5) = params[4]   # layer 5 has no BN -> gamma/beta never shipped

    w1b = w1.astype(jnp.bfloat16)                                        # (784, 1024)
    bgb1 = jnp.stack([b1, g1, be1], axis=0).astype(jnp.float32)          # (3, 1024)
    w2p = _pad_mat(w2, L1_OUT, LANE).astype(jnp.bfloat16)                # (1024, 128)
    w345 = jnp.stack([_pad_mat(w3, LANE, LANE),
                      _pad_mat(w4, LANE, LANE),
                      _pad_mat(w5, LANE, LANE)],
                     axis=0).astype(jnp.bfloat16)                        # (3, 128, 128)
    zeros = jnp.zeros((LANE,), jnp.float32)
    # gamma/beta padded with exact zeros: dead lanes stay 0 after BN even for
    # sigmoid (sigmoid(0)=0.5 is multiplied by gamma=0 and shifted by beta=0).
    sp = jnp.stack([
        jnp.stack([_pad_vec(b2, LANE), _pad_vec(g2, LANE), _pad_vec(be2, LANE)]),
        jnp.stack([_pad_vec(b3, LANE), _pad_vec(g3, LANE), _pad_vec(be3, LANE)]),
        jnp.stack([_pad_vec(b4, LANE), _pad_vec(g4, LANE), _pad_vec(be4, LANE)]),
        jnp.stack([_pad_vec(b5, LANE), zeros, zeros]),
    ], axis=0)                                                           # (4, 3, 128)
    return w1b, bgb1, w2p, w345, sp


def fc_hero_forward(x_nchw, packed, a_type="relu"):
    n = x_nchw.shape[0]
    # x.view(N, -1); shipped once in bf16 so layer 1 is a native bf16 MXU matmul.
    x = x_nchw.reshape(n, -1).astype(jnp.bfloat16)
    w1b, bgb1, w2p, w345, sp = packed

    n_tiles = L1_OUT // TILE1     # = 2
    kernel = functools.partial(fc_hero_kernel, a_type=a_type)

    o1, o2345 = pl.pallas_call(
        kernel,
        out_shape=(jax.ShapeDtypeStruct((n, L1_OUT), jnp.float32),
                   jax.ShapeDtypeStruct((4, n, LANE), jnp.float32)),
        grid_spec=pltpu.PrefetchScalarGridSpec(
            num_scalar_prefetch=0,
            grid=(n_tiles,),
            in_specs=[
                pl.BlockSpec((n, IN_FEATURES), lambda j: (0, 0)),     # x (bf16, resident)
                pl.BlockSpec((IN_FEATURES, TILE1), lambda j: (0, j)), # W1 tile (bf16)
                pl.BlockSpec((3, L1_OUT), lambda j: (0, 0)),          # b/g/beta layer1 (resident)
                pl.BlockSpec((L1_OUT, LANE), lambda j: (0, 0)),       # W2 padded bf16
                pl.BlockSpec((3, LANE, LANE), lambda j: (0, 0, 0)),   # W3..W5 padded bf16
                pl.BlockSpec((4, 3, LANE), lambda j: (0, 0, 0)),      # b/g/beta layers 2..5
            ],
            out_specs=[
                pl.BlockSpec((n, L1_OUT), lambda j: (0, 0)),          # layer1 (resident accumulator)
                pl.BlockSpec((4, n, LANE), lambda j: (0, 0, 0)),      # layers 2..5 packed
            ],
        ),
        compiler_params=pltpu.CompilerParams(
            # Must stay "arbitrary": the epilogue consumes every layer-1 tile held in
            # core-local VMEM.  (v7x-only follow-up: split layer-1 into a "parallel"
            # call + tiny epilogue call to use the 2nd TensorCore, if measured worth it.)
            dimension_semantics=("arbitrary",)),
    )(x, w1b, bgb1, w2p, w345, sp)

    layer1 = o1
    layer2 = o2345[0, :, :20]
    layer3 = o2345[1, :, :20]
    layer4 = o2345[2, :, :20]
    layer5 = o2345[3, :, :10]
    # Same output convention as the PyTorch module.
    return [layer5, layer4, layer3, layer2, layer1]


def init_params(key):
    # Deterministic synthetic init, stored in f32 like the PyTorch module
    # (the reference module uses Network.weight_init).
    dims = [(IN_FEATURES, L1_OUT), (L1_OUT, 20), (20, 20), (20, 20), (20, 10)]
    params = []
    for fin, fout in dims:
        kw, kb, key = jax.random.split(key, 3)
        w = jax.random.normal(kw, (fin, fout), jnp.float32) * (1.0 / jnp.sqrt(fin))
        b = jax.random.normal(kb, (fout,), jnp.float32) * 0.01
        gamma = jnp.ones((fout,), jnp.float32)
        beta = jnp.zeros((fout,), jnp.float32)
        params.append((w, b, gamma, beta))
    return params


def _reference_forward(x_nchw, params, a_type="relu"):
    # Pure-JAX reference mirroring the kernel's accepted precision choices
    # (bf16 weights and bf16 matmul operands with f32 accumulation), so the
    # comparison validates the fused kernel logic with a tight tolerance.
    n = x_nchw.shape[0]
    h = x_nchw.reshape(n, -1).astype(jnp.float32)
    outs = []
    for i, (w, b, g, be) in enumerate(params):
        lhs = h.astype(jnp.bfloat16).astype(jnp.float32)
        rhs = w.astype(jnp.bfloat16).astype(jnp.float32)
        h = lhs @ rhs + b
        if i < 4:
            h = _activate(h, a_type)
            mean = jnp.mean(h, axis=0, keepdims=True)
            var = jnp.mean((h - mean) ** 2, axis=0, keepdims=True)
            h = g * (h - mean) * jax.lax.rsqrt(var + BN_EPS) + be
        outs.append(h)
    return outs[::-1]  # [layer5, layer4, layer3, layer2, layer1]


if __name__ == "__main__":
    key = jax.random.PRNGKey(0)
    kx, kp = jax.random.split(key)

    # Input consistent with Linear(784, ...): N=8, C=1, H=W=28 (NCHW).
    x = jax.random.normal(kx, (8, 1, 28, 28), jnp.float32)
    params = init_params(kp)

    # Pack/pad parameters once, outside the jitted per-call path.
    packed = pack_params(params)
    packed = jax.tree_util.tree_map(jax.block_until_ready, packed)

    fwd = jax.jit(functools.partial(fc_hero_forward, a_type="relu"))
    outs = fwd(x, packed)
    outs = [jax.block_until_ready(o) for o in outs]

    refs = _reference_forward(x, params, a_type="relu")
    names = ["layer5", "layer4", "layer3", "layer2", "layer1"]
    for nm, o, r in zip(names, outs, refs):
        assert o.shape == r.shape, (nm, o.shape, r.shape)
        err = float(jnp.max(jnp.abs(o - r)))
        assert err < 2e-3, (nm, err)

    print("KERNEL_OK")
</pallas_src>

<mosaic_0001>
module attributes {stable_mosaic.version = 11 : i64} {
  func.func @fc_hero_kernel(%arg0: i32, %arg1: memref<8x784xbf16, #tpu.memory_space<vmem>>, %arg2: memref<784x512xbf16, #tpu.memory_space<vmem>>, %arg3: memref<3x1024xf32, #tpu.memory_space<vmem>>, %arg4: memref<1024x128xbf16, #tpu.memory_space<vmem>>, %arg5: memref<3x128x128xbf16, #tpu.memory_space<vmem>>, %arg6: memref<4x3x128xf32, #tpu.memory_space<vmem>>, %arg7: memref<8x1024xf32, #tpu.memory_space<vmem>>, %arg8: memref<4x8x128xf32, #tpu.memory_space<vmem>>) attributes {dimension_semantics = [#tpu.dimension_semantics<arbitrary>], iteration_bounds = array<i64: 2>, scalar_prefetch = 0 : i64, scratch_operands = 0 : i64, tpu.core_type = #tpu.core_type<tc>, window_params = [{pipeline_mode = #tpu.pipeline_mode<synchronous>, transform_indices = @transform_0, window_bounds = array<i64: 8, 784>}, {transform_indices = @transform_1, window_bounds = array<i64: 784, 512>}, {pipeline_mode = #tpu.pipeline_mode<synchronous>, transform_indices = @transform_2, window_bounds = array<i64: 3, 1024>}, {pipeline_mode = #tpu.pipeline_mode<synchronous>, transform_indices = @transform_3, window_bounds = array<i64: 1024, 128>}, {pipeline_mode = #tpu.pipeline_mode<synchronous>, transform_indices = @transform_4, window_bounds = array<i64: 3, 128, 128>}, {pipeline_mode = #tpu.pipeline_mode<synchronous>, transform_indices = @transform_5, window_bounds = array<i64: 4, 3, 128>}, {pipeline_mode = #tpu.pipeline_mode<synchronous>, transform_indices = @transform_6, window_bounds = array<i64: 8, 1024>}, {pipeline_mode = #tpu.pipeline_mode<synchronous>, transform_indices = @transform_7, window_bounds = array<i64: 4, 8, 128>}]} {
    %c512_i32 = arith.constant 512 : i32
    %0 = arith.muli %arg0, %c512_i32 : i32
    %1 = tpu.assume_multiple %0, 512 : i32
    %c0 = arith.constant 0 : index
    %c0_0 = arith.constant 0 : index
    %2 = vector.load %arg1[%c0, %c0_0] : memref<8x784xbf16, #tpu.memory_space<vmem>>, vector<8x784xbf16>
    %c0_1 = arith.constant 0 : index
    %c0_2 = arith.constant 0 : index
    %3 = vector.load %arg2[%c0_1, %c0_2] : memref<784x512xbf16, #tpu.memory_space<vmem>>, vector<784x512xbf16>
    %cst = arith.constant dense<0.000000e+00> : vector<8x512xf32>
    %4 = tpu.matmul %2, %3, %cst {dimension_numbers = #tpu.dot_dimension_numbers<[1], [0], [0], [1], [0, 0, 1, 1], [], []>} : vector<8x784xbf16>, vector<784x512xbf16>, vector<8x512xf32> -> vector<8x512xf32>
    %c0_3 = arith.constant 0 : index
    %5 = arith.index_cast %1 : i32 to index
    %6 = vector.load %arg3[%c0_3, %5] : memref<3x1024xf32, #tpu.memory_space<vmem>>, vector<3x512xf32>
    %7 = vector.extract_strided_slice %6 {offsets = [0, 0], sizes = [1, 512], strides = [1, 1]} : vector<3x512xf32> to vector<1x512xf32>
    %8 = vector.broadcast %7 : vector<1x512xf32> to vector<8x512xf32>
    %9 = arith.addf %4, %8 : vector<8x512xf32>
    %cst_4 = arith.constant 0.000000e+00 : f32
    %10 = vector.broadcast %cst_4 : f32 to vector<8x512xf32>
    %11 = arith.maximumf %9, %10 : vector<8x512xf32>
    %12 = vector.extract_strided_slice %6 {offsets = [1, 0], sizes = [1, 512], strides = [1, 1]} : vector<3x512xf32> to vector<1x512xf32>
    %13 = vector.extract_strided_slice %6 {offsets = [2, 0], sizes = [1, 512], strides = [1, 1]} : vector<3x512xf32> to vector<1x512xf32>
    %cst_5 = arith.constant dense<0.000000e+00> : vector<512xf32>
    %14 = vector.multi_reduction <add>, %11, %cst_5 [0] : vector<8x512xf32> to vector<512xf32>
    %15 = vector.shape_cast %14 : vector<512xf32> to vector<1x512xf32>
    %cst_6 = arith.constant 8.000000e+00 : f32
    %16 = vector.broadcast %cst_6 : f32 to vector<1x512xf32>
    %17 = arith.divf %15, %16 : vector<1x512xf32>
    %18 = vector.broadcast %17 : vector<1x512xf32> to vector<8x512xf32>
    %19 = arith.subf %11, %18 : vector<8x512xf32>
    %20 = arith.mulf %19, %19 : vector<8x512xf32>
    %cst_7 = arith.constant dense<0.000000e+00> : vector<512xf32>
    %21 = vector.multi_reduction <add>, %20, %cst_7 [0] : vector<8x512xf32> to vector<512xf32>
    %22 = vector.shape_cast %21 : vector<512xf32> to vector<1x512xf32>
    %cst_8 = arith.constant 8.000000e+00 : f32
    %23 = vector.broadcast %cst_8 : f32 to vector<1x512xf32>
    %24 = arith.divf %22, %23 : vector<1x512xf32>
    %25 = vector.broadcast %17 : vector<1x512xf32> to vector<8x512xf32>
    %26 = arith.subf %11, %25 : vector<8x512xf32>
    %27 = vector.broadcast %12 : vector<1x512xf32> to vector<8x512xf32>
    %28 = arith.mulf %27, %26 : vector<8x512xf32>
    %cst_9 = arith.constant 9.99999974E-6 : f32
    %29 = vector.broadcast %cst_9 : f32 to vector<1x512xf32>
    %30 = arith.addf %24, %29 : vector<1x512xf32>
    %31 = math.rsqrt %30 : vector<1x512xf32>
    %32 = vector.broadcast %31 : vector<1x512xf32> to vector<8x512xf32>
    %33 = arith.mulf %28, %32 : vector<8x512xf32>
    %34 = vector.broadcast %13 : vector<1x512xf32> to vector<8x512xf32>
    %35 = arith.addf %33, %34 : vector<8x512xf32>
    %c0_10 = arith.constant 0 : index
    %36 = arith.index_cast %1 : i32 to index
    %37 = vector.load %arg7[%c0_10, %36] : memref<8x1024xf32, #tpu.memory_space<vmem>>, vector<8x512xf32>
    tpu.vector_store %arg7[%c0_10, %36], %35 {strides = array<i32>} : memref<8x1024xf32, #tpu.memory_space<vmem>>, vector<8x512xf32>,
    %c1_i32 = arith.constant 1 : i32
    %38 = arith.cmpi eq, %arg0, %c1_i32 : i32
    %39 = arith.extui %38 : i1 to i32
    %c0_i32 = arith.constant 0 : i32
    %40 = arith.cmpi ne, %39, %c0_i32 : i32
    scf.if %40 {
      %c0_11 = arith.constant 0 : index
      %c0_12 = arith.constant 0 : index
      %c0_13 = arith.constant 0 : index
      %41 = vector.load %arg6[%c0_11, %c0_12, %c0_13] : memref<4x3x128xf32, #tpu.memory_space<vmem>>, vector<4x3x128xf32>
      %c0_14 = arith.constant 0 : index
      %c0_15 = arith.constant 0 : index
      %c0_16 = arith.constant 0 : index
      %42 = vector.load %arg5[%c0_14, %c0_15, %c0_16] : memref<3x128x128xbf16, #tpu.memory_space<vmem>>, vector<3x128x128xbf16>
      %c0_17 = arith.constant 0 : index
      %c0_18 = arith.constant 0 : index
      %43 = vector.load %arg7[%c0_17, %c0_18] : memref<8x1024xf32, #tpu.memory_space<vmem>>, vector<8x1024xf32>
      %44 = arith.truncf %43 : vector<8x1024xf32> to vector<8x1024xbf16>
      %c0_19 = arith.constant 0 : index
      %c0_20 = arith.constant 0 : index
      %45 = vector.load %arg4[%c0_19, %c0_20] : memref<1024x128xbf16, #tpu.memory_space<vmem>>, vector<1024x128xbf16>
      %cst_21 = arith.constant dense<0.000000e+00> : vector<8x128xf32>
      %46 = tpu.matmul %44, %45, %cst_21 {dimension_numbers = #tpu.dot_dimension_numbers<[1], [0], [0], [1], [0, 0, 1, 1], [], []>} : vector<8x1024xbf16>, vector<1024x128xbf16>, vector<8x128xf32> -> vector<8x128xf32>
      %47 = vector.extract_strided_slice %41 {offsets = [0, 0, 0], sizes = [1, 1, 128], strides = [1, 1, 1]} : vector<4x3x128xf32> to vector<1x1x128xf32>
      %48 = vector.shape_cast %47 : vector<1x1x128xf32> to vector<1x128xf32>
      %49 = vector.broadcast %48 : vector<1x128xf32> to vector<8x128xf32>
      %50 = arith.addf %46, %49 : vector<8x128xf32>
      %cst_22 = arith.constant 0.000000e+00 : f32
      %51 = vector.broadcast %cst_22 : f32 to vector<8x128xf32>
      %52 = arith.maximumf %50, %51 : vector<8x128xf32>
      %53 = vector.extract_strided_slice %41 {offsets = [0, 1, 0], sizes = [1, 1, 128], strides = [1, 1, 1]} : vector<4x3x128xf32> to vector<1x1x128xf32>
      %54 = vector.shape_cast %53 : vector<1x1x128xf32> to vector<1x128xf32>
      %55 = vector.extract_strided_slice %41 {offsets = [0, 2, 0], sizes = [1, 1, 128], strides = [1, 1, 1]} : vector<4x3x128xf32> to vector<1x1x128xf32>
      %56 = vector.shape_cast %55 : vector<1x1x128xf32> to vector<1x128xf32>
      %cst_23 = arith.constant dense<0.000000e+00> : vector<128xf32>
      %57 = vector.multi_reduction <add>, %52, %cst_23 [0] : vector<8x128xf32> to vector<128xf32>
      %58 = vector.shape_cast %57 : vector<128xf32> to vector<1x128xf32>
      %cst_24 = arith.constant 8.000000e+00 : f32
      %59 = vector.broadcast %cst_24 : f32 to vector<1x128xf32>
      %60 = arith.divf %58, %59 : vector<1x128xf32>
      %61 = vector.broadcast %60 : vector<1x128xf32> to vector<8x128xf32>
      %62 = arith.subf %52, %61 : vector<8x128xf32>
      %63 = arith.mulf %62, %62 : vector<8x128xf32>
      %cst_25 = arith.constant dense<0.000000e+00> : vector<128xf32>
      %64 = vector.multi_reduction <add>, %63, %cst_25 [0] : vector<8x128xf32> to vector<128xf32>
      %65 = vector.shape_cast %64 : vector<128xf32> to vector<1x128xf32>
      %cst_26 = arith.constant 8.000000e+00 : f32
      %66 = vector.broadcast %cst_26 : f32 to vector<1x128xf32>
      %67 = arith.divf %65, %66 : vector<1x128xf32>
      %68 = vector.broadcast %60 : vector<1x128xf32> to vector<8x128xf32>
      %69 = arith.subf %52, %68 : vector<8x128xf32>
      %70 = vector.broadcast %54 : vector<1x128xf32> to vector<8x128xf32>
      %71 = arith.mulf %70, %69 : vector<8x128xf32>
      %cst_27 = arith.constant 9.99999974E-6 : f32
      %72 = vector.broadcast %cst_27 : f32 to vector<1x128xf32>
      %73 = arith.addf %67, %72 : vector<1x128xf32>
      %74 = math.rsqrt %73 : vector<1x128xf32>
      %75 = vector.broadcast %74 : vector<1x128xf32> to vector<8x128xf32>
      %76 = arith.mulf %71, %75 : vector<8x128xf32>
      %77 = vector.broadcast %56 : vector<1x128xf32> to vector<8x128xf32>
      %78 = arith.addf %76, %77 : vector<8x128xf32>
      %79 = arith.truncf %78 : vector<8x128xf32> to vector<8x128xbf16>
      %80 = vector.extract_strided_slice %42 {offsets = [0, 0, 0], sizes = [1, 128, 128], strides = [1, 1, 1]} : vector<3x128x128xbf16> to vector<1x128x128xbf16>
      %81 = vector.shape_cast %80 : vector<1x128x128xbf16> to vector<128x128xbf16>
      %cst_28 = arith.constant dense<0.000000e+00> : vector<8x128xf32>
      %82 = tpu.matmul %79, %81, %cst_28 {dimension_numbers = #tpu.dot_dimension_numbers<[1], [0], [0], [1], [0, 0, 1, 1], [], []>} : vector<8x128xbf16>, vector<128x128xbf16>, vector<8x128xf32> -> vector<8x128xf32>
      %83 = vector.extract_strided_slice %41 {offsets = [1, 0, 0], sizes = [1, 1, 128], strides = [1, 1, 1]} : vector<4x3x128xf32> to vector<1x1x128xf32>
      %84 = vector.shape_cast %83 : vector<1x1x128xf32> to vector<1x128xf32>
      %85 = vector.broadcast %84 : vector<1x128xf32> to vector<8x128xf32>
      %86 = arith.addf %82, %85 : vector<8x128xf32>
      %cst_29 = arith.constant 0.000000e+00 : f32
      %87 = vector.broadcast %cst_29 : f32 to vector<8x128xf32>
      %88 = arith.maximumf %86, %87 : vector<8x128xf32>
      %89 = vector.extract_strided_slice %41 {offsets = [1, 1, 0], sizes = [1, 1, 128], strides = [1, 1, 1]} : vector<4x3x128xf32> to vector<1x1x128xf32>
      %90 = vector.shape_cast %89 : vector<1x1x128xf32> to vector<1x128xf32>
      %91 = vector.extract_strided_slice %41 {offsets = [1, 2, 0], sizes = [1, 1, 128], strides = [1, 1, 1]} : vector<4x3x128xf32> to vector<1x1x128xf32>
      %92 = vector.shape_cast %91 : vector<1x1x128xf32> to vector<1x128xf32>
      %cst_30 = arith.constant dense<0.000000e+00> : vector<128xf32>
      %93 = vector.multi_reduction <add>, %88, %cst_30 [0] : vector<8x128xf32> to vector<128xf32>
      %94 = vector.shape_cast %93 : vector<128xf32> to vector<1x128xf32>
      %cst_31 = arith.constant 8.000000e+00 : f32
      %95 = vector.broadcast %cst_31 : f32 to vector<1x128xf32>
      %96 = arith.divf %94, %95 : vector<1x128xf32>
      %97 = vector.broadcast %96 : vector<1x128xf32> to vector<8x128xf32>
      %98 = arith.subf %88, %97 : vector<8x128xf32>
      %99 = arith.mulf %98, %98 : vector<8x128xf32>
      %cst_32 = arith.constant dense<0.000000e+00> : vector<128xf32>
      %100 = vector.multi_reduction <add>, %99, %cst_32 [0] : vector<8x128xf32> to vector<128xf32>
      %101 = vector.shape_cast %100 : vector<128xf32> to vector<1x128xf32>
      %cst_33 = arith.constant 8.000000e+00 : f32
      %102 = vector.broadcast %cst_33 : f32 to vector<1x128xf32>
      %103 = arith.divf %101, %102 : vector<1x128xf32>
      %104 = vector.broadcast %96 : vector<1x128xf32> to vector<8x128xf32>
      %105 = arith.subf %88, %104 : vector<8x128xf32>
      %106 = vector.broadcast %90 : vector<1x128xf32> to vector<8x128xf32>
      %107 = arith.mulf %106, %105 : vector<8x128xf32>
      %cst_34 = arith.constant 9.99999974E-6 : f32
      %108 = vector.broadcast %cst_34 : f32 to vector<1x128xf32>
      %109 = arith.addf %103, %108 : vector<1x128xf32>
      %110 = math.rsqrt %109 : vector<1x128xf32>
      %111 = vector.broadcast %110 : vector<1x128xf32> to vector<8x128xf32>
      %112 = arith.mulf %107, %111 : vector<8x128xf32>
      %113 = vector.broadcast %92 : vector<1x128xf32> to vector<8x128xf32>
      %114 = arith.addf %112, %113 : vector<8x128xf32>
      %115 = arith.truncf %114 : vector<8x128xf32> to vector<8x128xbf16>
      %116 = vector.extract_strided_slice %42 {offsets = [1, 0, 0], sizes = [1, 128, 128], strides = [1, 1, 1]} : vector<3x128x128xbf16> to vector<1x128x128xbf16>
      %117 = vector.shape_cast %116 : vector<1x128x128xbf16> to vector<128x128xbf16>
      %cst_35 = arith.constant dense<0.000000e+00> : vector<8x128xf32>
      %118 = tpu.matmul %115, %117, %cst_35 {dimension_numbers = #tpu.dot_dimension_numbers<[1], [0], [0], [1], [0, 0, 1, 1], [], []>} : vector<8x128xbf16>, vector<128x128xbf16>, vector<8x128xf32> -> vector<8x128xf32>
      %119 = vector.extract_strided_slice %41 {offsets = [2, 0, 0], sizes = [1, 1, 128], strides = [1, 1, 1]} : vector<4x3x128xf32> to vector<1x1x128xf32>
      %120 = vector.shape_cast %119 : vector<1x1x128xf32> to vector<1x128xf32>
      %121 = vector.broadcast %120 : vector<1x128xf32> to vector<8x128xf32>
      %122 = arith.addf %118, %121 : vector<8x128xf32>
      %cst_36 = arith.constant 0.000000e+00 : f32
      %123 = vector.broadcast %cst_36 : f32 to vector<8x128xf32>
      %124 = arith.maximumf %122, %123 : vector<8x128xf32>
      %125 = vector.extract_strided_slice %41 {offsets = [2, 1, 0], sizes = [1, 1, 128], strides = [1, 1, 1]} : vector<4x3x128xf32> to vector<1x1x128xf32>
      %126 = vector.shape_cast %125 : vector<1x1x128xf32> to vector<1x128xf32>
      %127 = vector.extract_strided_slice %41 {offsets = [2, 2, 0], sizes = [1, 1, 128], strides = [1, 1, 1]} : vector<4x3x128xf32> to vector<1x1x128xf32>
      %128 = vector.shape_cast %127 : vector<1x1x128xf32> to vector<1x128xf32>
      %cst_37 = arith.constant dense<0.000000e+00> : vector<128xf32>
      %129 = vector.multi_reduction <add>, %124, %cst_37 [0] : vector<8x128xf32> to vector<128xf32>
      %130 = vector.shape_cast %129 : vector<128xf32> to vector<1x128xf32>
      %cst_38 = arith.constant 8.000000e+00 : f32
      %131 = vector.broadcast %cst_38 : f32 to vector<1x128xf32>
      %132 = arith.divf %130, %131 : vector<1x128xf32>
      %133 = vector.broadcast %132 : vector<1x128xf32> to vector<8x128xf32>
      %134 = arith.subf %124, %133 : vector<8x128xf32>
      %135 = arith.mulf %134, %134 : vector<8x128xf32>
      %cst_39 = arith.constant dense<0.000000e+00> : vector<128xf32>
      %136 = vector.multi_reduction <add>, %135, %cst_39 [0] : vector<8x128xf32> to vector<128xf32>
      %137 = vector.shape_cast %136 : vector<128xf32> to vector<1x128xf32>
      %cst_40 = arith.constant 8.000000e+00 : f32
      %138 = vector.broadcast %cst_40 : f32 to vector<1x128xf32>
      %139 = arith.divf %137, %138 : vector<1x128xf32>
      %140 = vector.broadcast %132 : vector<1x128xf32> to vector<8x128xf32>
      %141 = arith.subf %124, %140 : vector<8x128xf32>
      %142 = vector.broadcast %126 : vector<1x128xf32> to vector<8x128xf32>
      %143 = arith.mulf %142, %141 : vector<8x128xf32>
      %cst_41 = arith.constant 9.99999974E-6 : f32
      %144 = vector.broadcast %cst_41 : f32 to vector<1x128xf32>
      %145 = arith.addf %139, %144 : vector<1x128xf32>
      %146 = math.rsqrt %145 : vector<1x128xf32>
      %147 = vector.broadcast %146 : vector<1x128xf32> to vector<8x128xf32>
      %148 = arith.mulf %143, %147 : vector<8x128xf32>
      %149 = vector.broadcast %128 : vector<1x128xf32> to vector<8x128xf32>
      %150 = arith.addf %148, %149 : vector<8x128xf32>
      %151 = arith.truncf %150 : vector<8x128xf32> to vector<8x128xbf16>
      %152 = vector.extract_strided_slice %42 {offsets = [2, 0, 0], sizes = [1, 128, 128], strides = [1, 1, 1]} : vector<3x128x128xbf16> to vector<1x128x128xbf16>
      %153 = vector.shape_cast %152 : vector<1x128x128xbf16> to vector<128x128xbf16>
      %cst_42 = arith.constant dense<0.000000e+00> : vector<8x128xf32>
      %154 = tpu.matmul %151, %153, %cst_42 {dimension_numbers = #tpu.dot_dimension_numbers<[1], [0], [0], [1], [0, 0, 1, 1], [], []>} : vector<8x128xbf16>, vector<128x128xbf16>, vector<8x128xf32> -> vector<8x128xf32>
      %155 = vector.extract_strided_slice %41 {offsets = [3, 0, 0], sizes = [1, 1, 128], strides = [1, 1, 1]} : vector<4x3x128xf32> to vector<1x1x128xf32>
      %156 = vector.shape_cast %155 : vector<1x1x128xf32> to vector<1x128xf32>
      %157 = vector.broadcast %156 : vector<1x128xf32> to vector<8x128xf32>
      %158 = arith.addf %154, %157 : vector<8x128xf32>
      %c0_43 = arith.constant 0 : index
      %c0_44 = arith.constant 0 : index
      %c0_45 = arith.constant 0 : index
      %159 = vector.load %arg8[%c0_43, %c0_44, %c0_45] : memref<4x8x128xf32, #tpu.memory_space<vmem>>, vector<1x8x128xf32>
      %160 = vector.shape_cast %159 : vector<1x8x128xf32> to vector<8x128xf32>
      %161 = vector.shape_cast %78 : vector<8x128xf32> to vector<1x8x128xf32>
      tpu.vector_store %arg8[%c0_43, %c0_44, %c0_45], %161 {strides = array<i32>} : memref<4x8x128xf32, #tpu.memory_space<vmem>>, vector<1x8x128xf32>,
      %c1 = arith.constant 1 : index
      %c0_46 = arith.constant 0 : index
      %c0_47 = arith.constant 0 : index
      %162 = vector.load %arg8[%c1, %c0_46, %c0_47] : memref<4x8x128xf32, #tpu.memory_space<vmem>>, vector<1x8x128xf32>
      %163 = vector.shape_cast %162 : vector<1x8x128xf32> to vector<8x128xf32>
      %164 = vector.shape_cast %114 : vector<8x128xf32> to vector<1x8x128xf32>
      tpu.vector_store %arg8[%c1, %c0_46, %c0_47], %164 {strides = array<i32>} : memref<4x8x128xf32, #tpu.memory_space<vmem>>, vector<1x8x128xf32>,
      %c2 = arith.constant 2 : index
      %c0_48 = arith.constant 0 : index
      %c0_49 = arith.constant 0 : index
      %165 = vector.load %arg8[%c2, %c0_48, %c0_49] : memref<4x8x128xf32, #tpu.memory_space<vmem>>, vector<1x8x128xf32>
      %166 = vector.shape_cast %165 : vector<1x8x128xf32> to vector<8x128xf32>
      %167 = vector.shape_cast %150 : vector<8x128xf32> to vector<1x8x128xf32>
      tpu.vector_store %arg8[%c2, %c0_48, %c0_49], %167 {strides = array<i32>} : memref<4x8x128xf32, #tpu.memory_space<vmem>>, vector<1x8x128xf32>,
      %c3 = arith.constant 3 : index
      %c0_50 = arith.constant 0 : index
      %c0_51 = arith.constant 0 : index
      %168 = vector.load %arg8[%c3, %c0_50, %c0_51] : memref<4x8x128xf32, #tpu.memory_space<vmem>>, vector<1x8x128xf32>
      %169 = vector.shape_cast %168 : vector<1x8x128xf32> to vector<8x128xf32>
      %170 = vector.shape_cast %158 : vector<8x128xf32> to vector<1x8x128xf32>
      tpu.vector_store %arg8[%c3, %c0_50, %c0_51], %170 {strides = array<i32>} : memref<4x8x128xf32, #tpu.memory_space<vmem>>, vector<1x8x128xf32>,
    } else {
    }
    return
  }
  func.func @transform_0(%arg0: i32) -> (i32, i32) {
    %c0_i32 = arith.constant 0 : i32
    %c0_i32_0 = arith.constant 0 : i32
    %c0_i32_1 = arith.constant 0 : i32
    return %c0_i32, %c0_i32_0 : i32, i32
  }
  func.func @transform_1(%arg0: i32) -> (i32, i32) {
    %c0_i32 = arith.constant 0 : i32
    %c0_i32_0 = arith.constant 0 : i32
    return %c0_i32, %arg0 : i32, i32
  }
  func.func @transform_2(%arg0: i32) -> (i32, i32) {
    %c0_i32 = arith.constant 0 : i32
    %c0_i32_0 = arith.constant 0 : i32
    %c0_i32_1 = arith.constant 0 : i32
    return %c0_i32, %c0_i32_0 : i32, i32
  }
  func.func @transform_3(%arg0: i32) -> (i32, i32) {
    %c0_i32 = arith.constant 0 : i32
    %c0_i32_0 = arith.constant 0 : i32
    %c0_i32_1 = arith.constant 0 : i32
    return %c0_i32, %c0_i32_0 : i32, i32
  }
  func.func @transform_4(%arg0: i32) -> (i32, i32, i32) {
    %c0_i32 = arith.constant 0 : i32
    %c0_i32_0 = arith.constant 0 : i32
    %c0_i32_1 = arith.constant 0 : i32
    %c0_i32_2 = arith.constant 0 : i32
    return %c0_i32, %c0_i32_0, %c0_i32_1 : i32, i32, i32
  }
  func.func @transform_5(%arg0: i32) -> (i32, i32, i32) {
    %c0_i32 = arith.constant 0 : i32
    %c0_i32_0 = arith.constant 0 : i32
    %c0_i32_1 = arith.constant 0 : i32
    %c0_i32_2 = arith.constant 0 : i32
    return %c0_i32, %c0_i32_0, %c0_i32_1 : i32, i32, i32
  }
  func.func @transform_6(%arg0: i32) -> (i32, i32) {
    %c0_i32 = arith.constant 0 : i32
    %c0_i32_0 = arith.constant 0 : i32
    %c0_i32_1 = arith.constant 0 : i32
    return %c0_i32, %c0_i32_0 : i32, i32
  }
  func.func @transform_7(%arg0: i32) -> (i32, i32, i32) {
    %c0_i32 = arith.constant 0 : i32
    %c0_i32_0 = arith.constant 0 : i32
    %c0_i32_1 = arith.constant 0 : i32
    %c0_i32_2 = arith.constant 0 : i32
    return %c0_i32, %c0_i32_0, %c0_i32_1 : i32, i32, i32
  }
}

</mosaic_0001>

<bundles_post_ra>
// kernel: fc_hero_forward.1
= control target key start
LH: loop header
LB: loop body
LE: loop exit
PB: predicated region body
PF: predicated region fallthrough
CT: control target
= control target key end

     0   :  { %s5064_s0 = inlined_call_operand.vmem [shape: bf16[8,784], index: 0, kind: input, shape index: {}]   ;;  %s5065_s1 = inlined_call_operand.hbm [shape: bf16[784,1024], index: 1, kind: input, shape index: {}]   ;;  %s5066_s2 = inlined_call_operand.hbm [shape: f32[3,1024], index: 2, kind: input, shape index: {}]   ;;  %s5067_s3 = inlined_call_operand.hbm [shape: bf16[1024,128], index: 3, kind: input, shape index: {}]   ;;  %s5068_s4 = inlined_call_operand.hbm [shape: bf16[3,128,128], index: 4, kind: input, shape index: {}]   ;;  %s5069_s5 = inlined_call_operand.vmem [shape: f32[4,3,128], index: 5, kind: input, shape index: {}]   ;;  %s5070_s6 = inlined_call_operand.hbm [shape: f32[8,1024], index: 6, kind: output, shape index: {0}]   ;;  %s5071_s7 = inlined_call_operand.vmem [shape: f32[4,8,128], index: 7, kind: output, shape index: {1}]  }
   0x1   :  { %5076 = sst [smem:[#allocation15_spill]] %s5066_s2 }
   0x2   :  { %13 = vsyncpa [#allocation3], 0 }
   0x3   :  { %15 = vsyncpa [#allocation3 + $0x1], 0 }
   0x4   :  { %16 = vsyncpa [#allocation6], 0 }
   0x5   :  { %17 = vsyncpa [#allocation9], 0 }
   0x6   :  { %18 = vsyncpa [#allocation4], 0  ;;  %s4508_s24 = smov 0   ;;  %s4510_s25 = smov 0  }
   0x7   :  { %s4512_s26 = smov 0   ;;  %s4514_s27 = smov 0  }
   0x8 LB: > { %s4527_s28 = sadd.s32 4294967295, %s4453_s27   ;;  %s4530_s29 = sadd.s32 1, %s4453_s27   ;;  %s4453_s27 = sphi %s4514_s27, %s5093_s27   ;;  %s4449_s26 = sphi %s4512_s26, %s5092_s26   ;;  %s4445_s25 = sphi %s4510_s25, %s5091_s25   ;;  %s4441_s24 = sphi %s4508_s24, %s5090_s24  }
   0x9   : > { %s49_s30 = ssub.s32 %s4453_s27, %s4530_s29  ;;  %s52_s8 = sadd.s32 1, %s4449_s26 }
   0xa   : > { %p50_p0 = scmp.eq.s32.totalorder %s49_s30, 0  ;;  %p59_p1 = scmp.ne.s32.totalorder %s4449_s26, %s4445_s25 }
   0xb   : > { %p60_p2 = scmp.eq.s32.totalorder %s4453_s27, 0  ;;  %p65_p3 = scmp.ne.s32.totalorder %s4445_s25, %s4441_s24 }
   0xc   : > { %s4540_s9 = scalar_select %p50_p0, %s4449_s26, %s52_s8  }
   0xd   : > { %p4542_p4 = por %p60_p2, %p59_p1  ;;  %p5072_p5 = scmp.eq.s32.totalorder %s4527_s28, 0 }
   0xe   : > { %p3296_p6 = scmp.ge.s32.totalorder %s4453_s27, 1  ;;  %p202_p7 = scmp.lt.s32.totalorder %s4453_s27, 3 }
   0xf   : > { %p4551_p8 = por %p5072_p5, %p65_p3  ;;  %s4455_s13 = smov [#allocation5]  }
  0x10   : > { %p4555_p9 = pnand %p3296_p6, %p202_p7  ;;  %s218_s14 = sshll.u32 %s4455_s13, 4  ;;  %s219_s14 = int_to_ptr.vmem [resolvable:$true] %s218_s14 }
  0x11   : > { %s5078_s11 = scalar_select %p4551_p8, 1, 0 }
  0x12   : > { %s5079_s12 = scalar_select %p4555_p9, 1, 0 }
  0x13   : > { %p3807_p10 = pneg %p4555_p9  ;;  %p3824_p11 = scmp.lt.s32.totalorder %s4453_s27, 2 }
  0x14   : > { %s4456_s16 = smov [#allocation7]   ;;  %s4288_s19 = scalar_lea.vmem %s219_s14, 512 }
  0x15   : > { %p4564_p12 = pnand %p3807_p10, %p5072_p5  ;;  %s228_s17 = sshll.u32 %s4456_s16, 4  ;;  %s229_s17 = int_to_ptr.vmem [resolvable:$true] %s228_s17 }
  0x16   : > { %p4570_p13 = pnand %p3824_p11, %p4542_p4  ;;  %p4289_p1 = scmp.ne.s32.totalorder %s219_s14, %s4288_s19 }
  0x17   : > { %p4279_p0 = pneg %p4564_p12  ;;  %p4296_p6 = scmp.lt.s32.totalorder %s219_s14, %s219_s14 }
  0x18   : > { %s5081_s18 = scalar_select %p4570_p13, 1, 0 }
  0x19   : > { %p4291_p2 = pnand %p4289_p1, %p4279_p0  ;;  %p4297_p7 = scmp.lt.s32.totalorder %s4288_s19, %s4288_s19 }
  0x1b   : > { %p4292_p3 = pneg %p4291_p2  ;;  %p4298_p10 = por %p4297_p7, %p4296_p6 }
  0x1d   : > { %p4299_p5 = pnand %p4298_p10, %p4292_p3 }
  0x1f   : > { %4302 = shalt.err (!%p4299_p5)
}
  0x20   : > { %s5082_s2 = sld [smem:[#allocation15_spill]]  ;;  %s4314_s22 = scalar_lea.vmem %s229_s17, 8192 }
  0x21   : > { %p4315_p4 = scmp.ne.s32.totalorder %s229_s17, %s4314_s22  ;;  %p4322_p1 = scmp.lt.s32.totalorder %s229_s17, %s229_s17 }
  0x22   : > { %p4323_p2 = scmp.lt.s32.totalorder %s4314_s22, %s4314_s22 }
  0x23   : > { %p4317_p11 = pnand %p4315_p4, %p4279_p0 }
  0x24   : > { %p4324_p9 = por %p4323_p2, %p4322_p1 }
  0x25   : > { %p4318_p8 = pneg %p4317_p11 }
  0x26   : > { %3810 = dma.hbm_to_vmem [thread:$0]  (!%p4564_p12), %s5082_s2, 512, %s219_s14, [#allocation6]  }
  0x27   : > { %p4325_p13 = pnand %p4324_p9, %p4318_p8 }
  0x29   : > { %4328 = shalt.err (!%p4325_p13)
}
  0x2a   : > { %s4457_s23 = smov 64   ;;  %s4458_s24 = smov 4  }
  0x2b   : > { %3813 = dma.hbm_to_vmem [thread:$0]  (!%p4564_p12), %s5067_s3, 8192, %s229_s17, [#allocation6], %s4457_s23, %s4457_s23, %s4458_s24  }
  0x2c   : > { %s258_s10 = sand.u32 1, %s4449_s26   ;;  %s4459_s13 = smov [#allocation8]  }
  0x2d   : > { %s241_s14 = sshll.u32 %s4459_s13, 4  ;;  %s3787_s16 = smul.u32 1568, %s258_s10  ;;  %s242_s14 = int_to_ptr.vmem [resolvable:$true] %s241_s14 }
  0x2e   : > { %s4340_s19 = scalar_lea.vmem %s242_s14, 3072  ;;  %p4348_p13 = scmp.lt.s32.totalorder %s242_s14, %s242_s14 }
  0x2f   : > { %p4341_p5 = scmp.ne.s32.totalorder %s242_s14, %s4340_s19  ;;  %p4349_p3 = scmp.lt.s32.totalorder %s4340_s19, %s4340_s19 }
  0x31   : > { %p4343_p8 = pnand %p4341_p5, %p4279_p0  ;;  %p4350_p6 = por %p4349_p3, %p4348_p13 }
  0x33   : > { %p4344_p9 = pneg %p4343_p8 }
  0x35   : > { %p4351_p7 = pnand %p4350_p6, %p4344_p9 }
  0x37   : > { %4354 = shalt.err (!%p4351_p7)
}
  0x38   : > { %3816 = dma.hbm_to_vmem [thread:$0]  (!%p4564_p12), %s5068_s4, 3072, %s242_s14, [#allocation9], %s4457_s23, %s4457_s23, %s4458_s24  }
  0x39   : > { %s3611_s21 = sshll.u32 %s4453_s27, 8  ;;  %s262_s13 = scalar_lea.vmem [#allocation2], %s3787_s16 }
  0x3a   : > { %s4605_s8 = scalar_lea.hbm %s5065_s1, %s3611_s21  ;;  %s269_s19 = sshll.u32 %s262_s13, 4  ;;  %s4607_s19 = int_to_ptr.vmem [resolvable:$true] %s269_s19 }
  0x3b   : > { %s4609_s15 = scalar_lea.sflag [#allocation3], %s258_s10  ;;  %s4355_s2 = scalar_lea.hbm %s4605_s8, 25088 }
  0x3c   : > { %p4356_p0 = scmp.ne.s32.totalorder %s4605_s8, %s4355_s2  ;;  %p5083_p10 = scmp.ne.s32.totalorder %s5081_s18, 0 }
  0x3d   : > { %s4360_s24 = scalar_lea.hbm %s5065_s1, 50176  ;;  %p4361_p1 = scmp.lt.s32.totalorder %s4605_s8, %s5065_s1 }
  0x3e   : > { %p4357_p4 = pneg %p5083_p10  ;;  %p4362_p2 = scmp.lt.s32.totalorder %s4360_s24, %s4355_s2 }
  0x40   : > { %p4358_p12 = pnand %p4357_p4, %p4356_p0  ;;  %p4363_p5 = por %p4362_p2, %p4361_p1 }
  0x42   : > { %p4359_p11 = pneg %p4358_p12 }
  0x44   : > { %p4364_p8 = pnand %p4363_p5, %p4359_p11 }
  0x46   : > { %4367 = shalt.err (!%p4364_p8)
}
  0x47   : > { %s4368_s10 = scalar_lea.vmem %s4607_s19, 25088  ;;  %s4460_s16 = smov [#allocation2]  }
  0x48   : > { %p4369_p9 = scmp.ne.s32.totalorder %s4607_s19, %s4368_s10  ;;  %s4373_s17 = sshll.u32 %s4460_s16, 4  ;;  %s4374_s17 = int_to_ptr.vmem [resolvable:$false] %s4373_s17 }
  0x49   : > { %s4375_s21 = scalar_lea.vmem %s4374_s17, 50176  ;;  %p4376_p6 = scmp.lt.s32.totalorder %s4607_s19, %s4374_s17 }
  0x4a   : > { %p4371_p13 = pnand %p4369_p9, %p4357_p4  ;;  %p4377_p7 = scmp.lt.s32.totalorder %s4375_s21, %s4368_s10 }
  0x4c   : > { %p4372_p3 = pneg %p4371_p13  ;;  %p4378_p0 = por %p4377_p7, %p4376_p6 }
  0x4e   : > { %p4379_p12 = pnand %p4378_p0, %p4372_p3 }
  0x50   : > { %4382 = shalt.err (!%p4379_p12)
}
  0x51   : > { %s4461_s2 = smov 512   ;;  %s4462_s22 = smov 256  }
  0x52   : > { %s4463_s30 = smov 16   ;;  %p5084_p4 = scmp.ne.s32.totalorder %s5079_s12, 0 }
  0x53   : > { %3820 = dma.hbm_to_vmem [thread:$0]  (!%p5083_p10), %s4605_s8, 25088, %s4607_s19, %s4609_s15, %s4461_s2, %s4462_s22, %s4463_s30  }
  0x54   : > { %281 = sbr.rel (%p5084_p4) target bundleno = 1591 (0x637), region = 44  ;;  %s283_s13 = sand.u32 (!%p5084_p4), 1, %s4445_s25  }
  0x55   : > { %s3788_s27 = smul.u32 (!%p5084_p4), 1568, %s283_s13  ;;  %s284_s23 = scalar_lea.sflag (!%p5084_p4), [#allocation3], %s283_s13 }
  0x56   : > { %p5085_p11 = scmp.ne.s32.totalorder (!%p5084_p4), %s5078_s11, 0 }
  0x57   : > { %s4633_s24 = scalar_lea.vmem (!%p5084_p4), [#allocation2], %s3788_s27 }
  0x59   : > { %4424 = dma.done.wait (%p5085_p11), %s284_s23, 25088  }
  0x5a   : > { %4426 = vsyncadd (%p5085_p11), %s284_s23, 4294942208  ;;  %p5086_p1 = scmp.eq.s32.totalorder %s4527_s28, 0 }
  0x5c   : > { %4428 = dma.done.wait (%p5086_p1), [#allocation6], 8704   ;;  %p5087_p10 = pmov %p5086_p1 }
  0x5d   : > { %p5088_p2 = pmov %p5086_p1 }
  0x5e   : > { %4430 = vsyncadd (%p5087_p10), [#allocation6], 4294958592 }
  0x5f   : > { %4432 = dma.done.wait (%p5088_p2), [#allocation9], 3072   ;;  %p5089_p5 = pmov %p5086_p1 }
  0x60   : > { %v3874_v0 = vld [vmem:[%s4633_s24 + $0xe4] ss:$16 sps:$4 sm:$0xff]   ;;  %v3878_v2 = vld [vmem:[%s4633_s24 + $0xe0] ss:$16 sps:$4 sm:$0xff]   ;;  %v329_v48 = vld [vmem:[%s5064_s0 + $0x8] sm:$0xff]  ;;  %vm1576_vm0 = vcmask 130048  }
  0x61   : > { %4434 = vsyncadd (%p5089_p5), [#allocation9], 4294964224  ;;  %v3876_v1 = vld [vmem:[%s4633_s24 + $0x2e4] ss:$16 sps:$4 sm:$0xff]   ;;  %1580 = vmatprep.subr.bf16.mxu0 %v3874_v0  ;;  %v3879_v3 = vld [vmem:[%s4633_s24 + $0x2e0] ss:$16 sps:$4 sm:$0xff]   ;;  %v4703_v51 = vcombine.high %v329_v48, %v329_v48 }
  0x62   : > { %1621 = vmatprep.subr.bf16.mxu1 %v3876_v1  ;;  %v3880_v4 = vld [vmem:[%s4633_s24 + $0xc4] ss:$16 sps:$4 sm:$0xff]   ;;  %1581 = vmatpush1.bf16.msra.mxu0 %v3878_v2  ;;  %v3884_v6 = vld [vmem:[%s4633_s24 + $0xc0] ss:$16 sps:$4 sm:$0xff]   ;;  %s3307_s10 = sshll.u32 %s4527_s28, 9  ;;  %p3515_p8 = scmp.ne.s32.totalorder %s4527_s28, 1 }
  0x63   : > { %1622 = vmatpush1.bf16.msra.mxu1 %v3879_v3  ;;  %v3882_v5 = vld [vmem:[%s4633_s24 + $0x2c4] ss:$16 sps:$4 sm:$0xff]   ;;  %1582 = vmatprep.subr.bf16.mxu0 %v3880_v4  ;;  %v3885_v7 = vld [vmem:[%s4633_s24 + $0x2c0] ss:$16 sps:$4 sm:$0xff]   ;;  %s4894_s16 = sshra.s32 %s3307_s10, 7 }
  0x64   : > { %1623 = vmatprep.subr.bf16.mxu1 %v3882_v5  ;;  %v3886_v8 = vld [vmem:[%s4633_s24 + $0xa4] ss:$16 sps:$4 sm:$0xff]   ;;  %v3890_v10 = vld [vmem:[%s4633_s24 + $0xa0] ss:$16 sps:$4 sm:$0xff]   ;;  %1653 = vmatprep.mubr.bf16.mxu1 %v4703_v51  ;;  %s3308_s17 = sshll.u32 %s4894_s16, 2  ;;  %s3514_s2 = sshll.u32 %s4894_s16, 3 }
  0x65   : > { %v3888_v9 = vld [vmem:[%s4633_s24 + $0x2a4] ss:$16 sps:$4 sm:$0xff]   ;;  %v3891_v11 = vld [vmem:[%s4633_s24 + $0x2a0] ss:$16 sps:$4 sm:$0xff]   ;;  %s4902_s21 = scalar_lea.vmem [#allocation5], %s3308_s17  ;;  %s4945_s22 = scalar_lea.vmem [#allocation10], %s3514_s2 }
  0x66   : > { %1583 = vmatpush1.bf16.msra.mxu0 %v3884_v6  ;;  %v3892_v12 = vld [vmem:[%s4633_s24 + $0x84] ss:$16 sps:$4 sm:$0xff]   ;;  %v3896_v14 = vld [vmem:[%s4633_s24 + $0x80] ss:$16 sps:$4 sm:$0xff]  }
  0x67   : > { %1624 = vmatpush1.bf16.msra.mxu1 %v3885_v7  ;;  %1584 = vmatprep.subr.bf16.mxu0 %v3886_v8  ;;  %v3894_v13 = vld [vmem:[%s4633_s24 + $0x284] ss:$16 sps:$4 sm:$0xff]   ;;  %v3897_v15 = vld [vmem:[%s4633_s24 + $0x280] ss:$16 sps:$4 sm:$0xff]   ;;  %v4727_v7 = vcombine.low %v329_v48, %v329_v48  ;;  %v4034_v48 = vld [vmem:[%s4633_s24 + $0x1ec] ss:$16 sps:$4 sm:$0xff]  }
  0x68   : > { %1625 = vmatprep.subr.bf16.mxu1 %v3888_v9  ;;  %v3898_v16 = vld [vmem:[%s4633_s24 + $0x64] ss:$16 sps:$4 sm:$0xff]   ;;  %v3902_v18 = vld [vmem:[%s4633_s24 + $0x60] ss:$16 sps:$4 sm:$0xff]  }
  0x69   : > { %v3900_v17 = vld [vmem:[%s4633_s24 + $0x264] ss:$16 sps:$4 sm:$0xff]   ;;  %v3903_v19 = vld [vmem:[%s4633_s24 + $0x260] ss:$16 sps:$4 sm:$0xff]  }
  0x6a   : > { %1585 = vmatpush1.bf16.msra.mxu0 %v3890_v10  ;;  %v3904_v20 = vld [vmem:[%s4633_s24 + $0x44] ss:$16 sps:$4 sm:$0xff]   ;;  %v3908_v22 = vld [vmem:[%s4633_s24 + $0x40] ss:$16 sps:$4 sm:$0xff]  }
  0x6b   : > { %1626 = vmatpush1.bf16.msra.mxu1 %v3891_v11  ;;  %1586 = vmatprep.subr.bf16.mxu0 %v3892_v12  ;;  %v3906_v21 = vld [vmem:[%s4633_s24 + $0x244] ss:$16 sps:$4 sm:$0xff]   ;;  %v3909_v23 = vld [vmem:[%s4633_s24 + $0x240] ss:$16 sps:$4 sm:$0xff]   ;;  %v3985_v11 = vld [vmem:[%s4633_s24 + $0xec] ss:$16 sps:$4 sm:$0xff]  }
  0x6c   : > { %1627 = vmatprep.subr.bf16.mxu1 %v3894_v13  ;;  %v3910_v24 = vld [vmem:[%s4633_s24 + $0x24] ss:$16 sps:$4 sm:$0xff]   ;;  %v3914_v26 = vld [vmem:[%s4633_s24 + $0x20] ss:$16 sps:$4 sm:$0xff]   ;;  %v4464_v13 = vmov 0  }
  0x6d   : > { %v3912_v25 = vld [vmem:[%s4633_s24 + $0x224] ss:$16 sps:$4 sm:$0xff]   ;;  %v3915_v27 = vld [vmem:[%s4633_s24 + $0x220] ss:$16 sps:$4 sm:$0xff]  }
  0x6e   : > { %1587 = vmatpush1.bf16.msra.mxu0 %v3896_v14  ;;  %v3916_v28 = vld [vmem:[%s4633_s24 + $0x4] ss:$16 sps:$4 sm:$0xff]   ;;  %v3920_v30 = vld [vmem:[%s4633_s24] ss:$16 sps:$4 sm:$0xff]  }
  0x6f   : > { %1628 = vmatpush1.bf16.msra.mxu1 %v3897_v15  ;;  %1588 = vmatprep.subr.bf16.mxu0 %v3898_v16  ;;  %v3918_v29 = vld [vmem:[%s4633_s24 + $0x204] ss:$16 sps:$4 sm:$0xff]   ;;  %v3921_v31 = vld [vmem:[%s4633_s24 + $0x200] ss:$16 sps:$4 sm:$0xff]   ;;  %v3983_v15 = vld [vmem:[%s4633_s24 + $0xe8] ss:$16 sps:$4 sm:$0xff]  }
  0x70   : > { %1629 = vmatprep.subr.bf16.mxu1 %v3900_v17  ;;  %v3922_v32 = vld [vmem:[%s4633_s24 + $0x1e4] ss:$16 sps:$4 sm:$0xff]   ;;  %v3926_v34 = vld [vmem:[%s4633_s24 + $0x1e0] ss:$16 sps:$4 sm:$0xff]   ;;  %v4743_v17 = vld [vmem:[%s5064_s0 + $0x18] ss:$0 sps:$4 sm:$0xff]  }
  0x71   : > { %v3924_v33 = vld [vmem:[%s4633_s24 + $0x3e4] ss:$16 sps:$4 sm:$0xff]   ;;  %v3927_v35 = vld [vmem:[%s4633_s24 + $0x3e0] ss:$16 sps:$4 sm:$0xff]  }
  0x72   : > { %1589 = vmatpush1.bf16.msra.mxu0 %v3902_v18  ;;  %v3928_v36 = vld [vmem:[%s4633_s24 + $0x1c4] ss:$16 sps:$4 sm:$0xff]   ;;  %v3932_v38 = vld [vmem:[%s4633_s24 + $0x1c0] ss:$16 sps:$4 sm:$0xff]   ;;  %v3992_v18 = vld [vmem:[%s4633_s24 + $0xcc] ss:$16 sps:$4 sm:$0xff]  }
  0x73   : > { %1630 = vmatpush1.bf16.msra.mxu1 %v3903_v19  ;;  %1590 = vmatprep.subr.bf16.mxu0 %v3904_v20  ;;  %v3930_v37 = vld [vmem:[%s4633_s24 + $0x3c4] ss:$16 sps:$4 sm:$0xff]   ;;  %v3933_v39 = vld [vmem:[%s4633_s24 + $0x3c0] ss:$16 sps:$4 sm:$0xff]   ;;  %v3990_v20 = vld [vmem:[%s4633_s24 + $0xc8] ss:$16 sps:$4 sm:$0xff]  }
  0x74   : > { %1631 = vmatprep.subr.bf16.mxu1 %v3906_v21  ;;  %v3934_v40 = vld [vmem:[%s4633_s24 + $0x1a4] ss:$16 sps:$4 sm:$0xff]   ;;  %v3938_v42 = vld [vmem:[%s4633_s24 + $0x1a0] ss:$16 sps:$4 sm:$0xff]  }
  0x75   : > { %v3936_v41 = vld [vmem:[%s4633_s24 + $0x3a4] ss:$16 sps:$4 sm:$0xff]   ;;  %v3939_v43 = vld [vmem:[%s4633_s24 + $0x3a0] ss:$16 sps:$4 sm:$0xff]  }
  0x76   : > { %1591 = vmatpush1.bf16.msra.mxu0 %v3908_v22  ;;  %v3940_v44 = vld [vmem:[%s4633_s24 + $0x184] ss:$16 sps:$4 sm:$0xff]   ;;  %v3944_v49 = vld [vmem:[%s4633_s24 + $0x180] ss:$16 sps:$4 sm:$0xff]   ;;  %v3998_v22 = vld [vmem:[%s4633_s24 + $0xac] ss:$16 sps:$4 sm:$0xff]  }
  0x77   : > { %1632 = vmatpush1.bf16.msra.mxu1 %v3909_v23  ;;  %1592 = vmatprep.subr.bf16.mxu0 %v3910_v24  ;;  %v3942_v45 = vld [vmem:[%s4633_s24 + $0x384] ss:$16 sps:$4 sm:$0xff]   ;;  %v3945_v50 = vld [vmem:[%s4633_s24 + $0x380] ss:$16 sps:$4 sm:$0xff]   ;;  %v3996_v24 = vld [vmem:[%s4633_s24 + $0xa8] ss:$16 sps:$4 sm:$0xff]  }
  0x78   : > { %1633 = vmatprep.subr.bf16.mxu1 %v3912_v25  ;;  %v328_v46 = vld [vmem:[%s5064_s0] sm:$0xff] }
  0x79   : > { %v4696_v47 = vcombine.high %v328_v46, %v328_v46  ;;  %v3946_v52 = vld [vmem:[%s4633_s24 + $0x164] ss:$16 sps:$4 sm:$0xff]   ;;  %v3950_v54 = vld [vmem:[%s4633_s24 + $0x160] ss:$16 sps:$4 sm:$0xff]   ;;  %v4725_v6 = vcombine.low %v328_v46, %v328_v46  ;;  %v4026_v46 = vld [vmem:[%s4633_s24 + $0x8] ss:$16 sps:$4 sm:$0xff]  }
  0x7a   : > { %1593 = vmatpush1.bf16.msra.mxu0 %v3914_v26  ;;  %v3948_v53 = vld [vmem:[%s4633_s24 + $0x364] ss:$16 sps:$4 sm:$0xff]   ;;  %v3951_v55 = vld [vmem:[%s4633_s24 + $0x360] ss:$16 sps:$4 sm:$0xff]   ;;  %v4004_v26 = vld [vmem:[%s4633_s24 + $0x8c] ss:$16 sps:$4 sm:$0xff]  }
  0x7b   : > { %1634 = vmatpush1.bf16.msra.mxu1 %v3915_v27  ;;  %1594 = vmatprep.subr.bf16.mxu0 %v3916_v28  ;;  %v3952_v56 = vld [vmem:[%s4633_s24 + $0x144] ss:$16 sps:$4 sm:$0xff]   ;;  %v3956_v58 = vld [vmem:[%s4633_s24 + $0x140] ss:$16 sps:$4 sm:$0xff]   ;;  %v4002_v28 = vld [vmem:[%s4633_s24 + $0x88] ss:$16 sps:$4 sm:$0xff]  }
  0x7c   : > { %1635 = vmatprep.subr.bf16.mxu1 %v3918_v29  ;;  %1612 = vmatprep.mubr.bf16.mxu0 %v4696_v47  ;;  %v3954_v57 = vld [vmem:[%s4633_s24 + $0x344] ss:$16 sps:$4 sm:$0xff]   ;;  %v3957_v59 = vld [vmem:[%s4633_s24 + $0x340] ss:$16 sps:$4 sm:$0xff]  }
  0x7d   : > { %v3958_v60 = vld [vmem:[%s4633_s24 + $0x124] ss:$16 sps:$4 sm:$0xff]   ;;  %v3962_v62 = vld [vmem:[%s4633_s24 + $0x120] ss:$16 sps:$4 sm:$0xff]  }
  0x7e   : > { %1595 = vmatpush1.bf16.msra.mxu0 %v3920_v30  ;;  %v3960_v61 = vld [vmem:[%s4633_s24 + $0x324] ss:$16 sps:$4 sm:$0xff]   ;;  %v3963_v63 = vld [vmem:[%s4633_s24 + $0x320] ss:$16 sps:$4 sm:$0xff]   ;;  %v4010_v30 = vld [vmem:[%s4633_s24 + $0x6c] ss:$16 sps:$4 sm:$0xff]  }
  0x7f   : > { %1636 = vmatpush1.bf16.msra.mxu1 %v3921_v31  ;;  %1596 = vmatprep.subr.bf16.mxu0 %v3922_v32  ;;  %v3964_v0 = vld [vmem:[%s4633_s24 + $0x104] ss:$16 sps:$4 sm:$0xff]   ;;  %v3968_v2 = vld [vmem:[%s4633_s24 + $0x100] ss:$16 sps:$4 sm:$0xff]  }
  0x80   : > { %1637 = vmatprep.subr.bf16.mxu1 %v3924_v33  ;;  %v3966_v1 = vld [vmem:[%s4633_s24 + $0x304] ss:$16 sps:$4 sm:$0xff]   ;;  %v3969_v3 = vld [vmem:[%s4633_s24 + $0x300] ss:$16 sps:$4 sm:$0xff]  }
  0x81   : > { %v3976_v4 = vld [vmem:[%s4633_s24 + $0x4e4] ss:$16 sps:$4 sm:$0xff]   ;;  %v3974_v8 = vld [vmem:[%s4633_s24 + $0x4e0] ss:$16 sps:$4 sm:$0xff]  }
  0x82   : > { %1597 = vmatpush2.bf16.msra.mxu0 %v3926_v34  ;;  %v3979_v5 = vld [vmem:[%s4633_s24 + $0x604] ss:$16 sps:$4 sm:$0xff]   ;;  %v3977_v9 = vld [vmem:[%s4633_s24 + $0x600] ss:$16 sps:$4 sm:$0xff]   ;;  %v4008_v34 = vld [vmem:[%s4633_s24 + $0x68] ss:$16 sps:$4 sm:$0xff]  }
  0x83   : > { %1638 = vmatpush2.bf16.msra.mxu1 %v3927_v35  ;;  %1598 = vmatprep.subr.bf16.mxu0 %v3928_v36  ;;  %v3982_v10 = vld [vmem:[%s4633_s24 + $0x4c4] ss:$16 sps:$4 sm:$0xff]   ;;  %v3980_v12 = vld [vmem:[%s4633_s24 + $0x4c0] ss:$16 sps:$4 sm:$0xff]   ;;  %v4016_v36 = vld [vmem:[%s4633_s24 + $0x4c] ss:$16 sps:$4 sm:$0xff]  }
  0x84   : > { %1639 = vmatprep.subr.bf16.mxu1 %v3930_v37  ;;  %v3988_v14 = vld [vmem:[%s4633_s24 + $0x4a4] ss:$16 sps:$4 sm:$0xff]   ;;  %v3986_v16 = vld [vmem:[%s4633_s24 + $0x4a0] ss:$16 sps:$4 sm:$0xff]  }
  0x85   : > { %v3995_v19 = vld [vmem:[%s4633_s24 + $0x484] ss:$16 sps:$4 sm:$0xff]   ;;  %v3993_v21 = vld [vmem:[%s4633_s24 + $0x480] ss:$16 sps:$4 sm:$0xff]  }
  0x86   : > { %1599 = vmatpush2.bf16.msra.mxu0 %v3932_v38  ;;  %v4001_v23 = vld [vmem:[%s4633_s24 + $0x464] ss:$16 sps:$4 sm:$0xff]   ;;  %v3999_v25 = vld [vmem:[%s4633_s24 + $0x460] ss:$16 sps:$4 sm:$0xff]   ;;  %v4014_v38 = vld [vmem:[%s4633_s24 + $0x48] ss:$16 sps:$4 sm:$0xff]  }
  0x87   : > { %1640 = vmatpush2.bf16.msra.mxu1 %v3933_v39  ;;  %1600 = vmatprep.subr.bf16.mxu0 %v3934_v40  ;;  %v4007_v27 = vld [vmem:[%s4633_s24 + $0x444] ss:$16 sps:$4 sm:$0xff]   ;;  %v4005_v29 = vld [vmem:[%s4633_s24 + $0x440] ss:$16 sps:$4 sm:$0xff]   ;;  %v4022_v40 = vld [vmem:[%s4633_s24 + $0x2c] ss:$16 sps:$4 sm:$0xff]  }
  0x88   : > { %1641 = vmatprep.subr.bf16.mxu1 %v3936_v41  ;;  %v4013_v31 = vld [vmem:[%s4633_s24 + $0x424] ss:$16 sps:$4 sm:$0xff]   ;;  %v4011_v35 = vld [vmem:[%s4633_s24 + $0x420] ss:$16 sps:$4 sm:$0xff]  }
  0x89   : > { %v4765_v32 = vld [vmem:[%s5064_s0 + $0x10] sm:$0xff] }
  0x8a   : > { %1601 = vmatpush2.bf16.msra.mxu0 %v3938_v42  ;;  %v4769_v33 = vcombine.high %v4765_v32, %v4765_v32  ;;  %v4019_v37 = vld [vmem:[%s4633_s24 + $0x404] ss:$16 sps:$4 sm:$0xff]   ;;  %v4017_v39 = vld [vmem:[%s4633_s24 + $0x400] ss:$16 sps:$4 sm:$0xff]   ;;  %v4020_v42 = vld [vmem:[%s4633_s24 + $0x28] ss:$16 sps:$4 sm:$0xff]  }
  0x8b   : > { %1642 = vmatpush2.bf16.msra.mxu1 %v3939_v43  ;;  %1602 = vmatprep.subr.bf16.mxu0 %v3940_v44  ;;  %v4025_v41 = vld [vmem:[%s4633_s24 + $0x5e4] ss:$16 sps:$4 sm:$0xff]   ;;  %v4023_v43 = vld [vmem:[%s4633_s24 + $0x5e0] ss:$16 sps:$4 sm:$0xff]   ;;  %v4028_v44 = vld [vmem:[%s4633_s24 + $0xc] ss:$16 sps:$4 sm:$0xff]  }
  0x8c   : > { %1643 = vmatprep.subr.bf16.mxu1 %v3942_v45  ;;  %v4031_v45 = vld [vmem:[%s4633_s24 + $0x5c4] ss:$16 sps:$4 sm:$0xff]  }
  0x8e   : > { %1603 = vmatpush2.bf16.msra.mxu0 %v3944_v49  ;;  %v4037_v49 = vld [vmem:[%s4633_s24 + $0x5a4] ss:$16 sps:$4 sm:$0xff]  }
  0x8f   : > { %1644 = vmatpush2.bf16.msra.mxu1 %v3945_v50  ;;  %1604 = vmatprep.subr.bf16.mxu0 %v3946_v52  ;;  %v4032_v50 = vld [vmem:[%s4633_s24 + $0x1e8] ss:$16 sps:$4 sm:$0xff]   ;;  %v4035_v52 = vld [vmem:[%s4633_s24 + $0x5a0] ss:$16 sps:$4 sm:$0xff]  }
  0x90   : > { %1645 = vmatprep.subr.bf16.mxu1 %v3948_v53  ;;  %v4040_v53 = vld [vmem:[%s4633_s24 + $0x1cc] ss:$16 sps:$4 sm:$0xff]  }
  0x92   : > { %1605 = vmatpush2.bf16.msra.mxu0 %v3950_v54  ;;  %v4043_v54 = vld [vmem:[%s4633_s24 + $0x584] ss:$16 sps:$4 sm:$0xff]  }
  0x93   : > { %1646 = vmatpush2.bf16.msra.mxu1 %v3951_v55  ;;  %1606 = vmatprep.subr.bf16.mxu0 %v3952_v56  ;;  %v4038_v55 = vld [vmem:[%s4633_s24 + $0x1c8] ss:$16 sps:$4 sm:$0xff]   ;;  %v4041_v56 = vld [vmem:[%s4633_s24 + $0x580] ss:$16 sps:$4 sm:$0xff]  }
  0x94   : > { %1647 = vmatprep.subr.bf16.mxu1 %v3954_v57  ;;  %v4046_v57 = vld [vmem:[%s4633_s24 + $0x1ac] ss:$16 sps:$4 sm:$0xff]  }
  0x96   : > { %1607 = vmatpush2.bf16.msra.mxu0 %v3956_v58  ;;  %v4049_v58 = vld [vmem:[%s4633_s24 + $0x564] ss:$16 sps:$4 sm:$0xff]  }
  0x97   : > { %1648 = vmatpush2.bf16.msra.mxu1 %v3957_v59  ;;  %1608 = vmatprep.subr.bf16.mxu0 %v3958_v60  ;;  %v4044_v59 = vld [vmem:[%s4633_s24 + $0x1a8] ss:$16 sps:$4 sm:$0xff]   ;;  %v4047_v60 = vld [vmem:[%s4633_s24 + $0x560] ss:$16 sps:$4 sm:$0xff]  }
  0x98   : > { %1649 = vmatprep.subr.bf16.mxu1 %v3960_v61  ;;  %v4052_v61 = vld [vmem:[%s4633_s24 + $0x18c] ss:$16 sps:$4 sm:$0xff]  }
  0x9a   : > { %1609 = vmatpush2.bf16.msra.mxu0 %v3962_v62  ;;  %v4055_v62 = vld [vmem:[%s4633_s24 + $0x544] ss:$16 sps:$4 sm:$0xff]  }
  0x9b   : > { %1650 = vmatpush2.bf16.msra.mxu1 %v3963_v63  ;;  %1610 = vmatprep.subr.bf16.mxu0 %v3964_v0  ;;  %v4050_v63 = vld [vmem:[%s4633_s24 + $0x188] ss:$16 sps:$4 sm:$0xff]   ;;  %v4053_v0 = vld [vmem:[%s4633_s24 + $0x540] ss:$16 sps:$4 sm:$0xff]  }
  0x9c   : > { %1651 = vmatprep.subr.bf16.mxu1 %v3966_v1  ;;  %v4058_v1 = vld [vmem:[%s4633_s24 + $0x16c] ss:$16 sps:$4 sm:$0xff]  }
  0x9e   : > { %1611 = vmatpush2.bf16.msra.mxu0 %v3968_v2  ;;  %v4061_v2 = vld [vmem:[%s4633_s24 + $0x524] ss:$16 sps:$4 sm:$0xff]  }
  0x9f   : > { %1652 = vmatpush2.bf16.msra.mxu1 %v3969_v3  ;;  %1662 = vmatprep.subr.bf16.mxu0 %v3976_v4  ;;  %v4056_v3 = vld [vmem:[%s4633_s24 + $0x168] ss:$16 sps:$4 sm:$0xff]   ;;  %v4059_v4 = vld [vmem:[%s4633_s24 + $0x520] ss:$16 sps:$4 sm:$0xff]  }
  0xa0   : > { %1717 = vmatprep.subr.bf16.mxu1 %v3979_v5  ;;  %v4064_v5 = vld [vmem:[%s4633_s24 + $0x14c] ss:$16 sps:$4 sm:$0xff]  }
  0xa1   : > { %1613 = vmatmul.mubr.bf16.vlgmr.msra.gmra.mxu0 %v4725_v6 }
  0xa2   : > { %1654 = vmatmul.mubr.bf16.vlgmr.msra.gmra.mxu1 %v4727_v7  ;;  %1663 = vmatpush1.bf16.msra.mxu0 %v3974_v8  ;;  %v4067_v8 = vld [vmem:[%s4633_s24 + $0x504] ss:$16 sps:$4 sm:$0xff]  }
  0xa3   : > { %1718 = vmatpush1.bf16.msra.mxu1 %v3977_v9  ;;  %1664 = vmatprep.subr.bf16.mxu0 %v3982_v10  ;;  %v4062_v9 = vld [vmem:[%s4633_s24 + $0x148] ss:$16 sps:$4 sm:$0xff]   ;;  %v4065_v10 = vld [vmem:[%s4633_s24 + $0x500] ss:$16 sps:$4 sm:$0xff]  }
  0xa4   : > { %1735 = vmatprep.mubr.bf16.mxu1 %v4464_v13  ;;  %1744 = vmatprep.subr.bf16.mxu1 %v3985_v11  ;;  %v4072_v11 = vld [vmem:[%s4633_s24 + $0x12c] ss:$16 sps:$4 sm:$0xff]  }
  0xa5   : > { %1694 = vmatprep.mubr.bf16.mxu0 %v4769_v33 }
  0xa6   : > { %1665 = vmatpush1.bf16.msra.mxu0 %v3980_v12  ;;  %v4075_v12 = vld [vmem:[%s4633_s24 + $0x2ec] ss:$16 sps:$4 sm:$0xff]  }
  0xa7   : > { %1666 = vmatprep.subr.bf16.mxu0 %v3988_v14  ;;  %v4814_v14 = vcombine.low %v4765_v32, %v4765_v32  ;;  %v4102_v32 = vld [vmem:[%s4633_s24 + $0x48c] ss:$16 sps:$4 sm:$0xff]  }
  0xaa   : > { %3512 = vmatmul.mubr.msk.bf16.vlgmr.msra.gmra.mxu1 %vm1576_vm0, %v4743_v17  ;;  %1667 = vmatpush1.bf16.msra.mxu0 %v3986_v16  ;;  %v4073_v16 = vld [vmem:[%s4633_s24 + $0x2e8] ss:$16 sps:$4 sm:$0xff]  }
  0xab   : > { %1745 = vmatpush1.bf16.msra.mxu1 %v3983_v15  ;;  %1668 = vmatprep.subr.bf16.mxu0 %v3995_v19  ;;  %v4070_v15 = vld [vmem:[%s4633_s24 + $0x128] ss:$16 sps:$4 sm:$0xff]   ;;  %v4081_v19 = vld [vmem:[%s4633_s24 + $0x2cc] ss:$16 sps:$4 sm:$0xff]  }
  0xac   : > { %1746 = vmatprep.subr.bf16.mxu1 %v3992_v18  ;;  %1776 = vmatprep.mubr.bf16.mxu1 %v4696_v47  ;;  %v4029_v47 = vld [vmem:[%s4633_s24 + $0x5c0] ss:$16 sps:$4 sm:$0xff]   ;;  %v4078_v18 = vld [vmem:[%s4633_s24 + $0x10c] ss:$16 sps:$4 sm:$0xff]  }
  0xae   : > { %1669 = vmatpush1.bf16.msra.mxu0 %v3993_v21  ;;  %v4079_v21 = vld [vmem:[%s4633_s24 + $0x2c8] ss:$16 sps:$4 sm:$0xff]  }
  0xaf   : > { %1747 = vmatpush1.bf16.msra.mxu1 %v3990_v20  ;;  %1670 = vmatprep.subr.bf16.mxu0 %v4001_v23  ;;  %v4076_v20 = vld [vmem:[%s4633_s24 + $0x108] ss:$16 sps:$4 sm:$0xff]   ;;  %v4087_v23 = vld [vmem:[%s4633_s24 + $0x2ac] ss:$16 sps:$4 sm:$0xff]  }
  0xb0   : > { %1748 = vmatprep.subr.bf16.mxu1 %v3998_v22  ;;  %v4084_v22 = vld [vmem:[%s4633_s24 + $0x4ec] ss:$16 sps:$4 sm:$0xff]  }
  0xb2   : > { %1671 = vmatpush1.bf16.msra.mxu0 %v3999_v25  ;;  %v4085_v25 = vld [vmem:[%s4633_s24 + $0x2a8] ss:$16 sps:$4 sm:$0xff]  }
  0xb3   : > { %1749 = vmatpush1.bf16.msra.mxu1 %v3996_v24  ;;  %1672 = vmatprep.subr.bf16.mxu0 %v4007_v27  ;;  %v4082_v24 = vld [vmem:[%s4633_s24 + $0x4e8] ss:$16 sps:$4 sm:$0xff]   ;;  %v4093_v27 = vld [vmem:[%s4633_s24 + $0x28c] ss:$16 sps:$4 sm:$0xff]  }
  0xb4   : > { %1750 = vmatprep.subr.bf16.mxu1 %v4004_v26  ;;  %v4090_v26 = vld [vmem:[%s4633_s24 + $0x4cc] ss:$16 sps:$4 sm:$0xff]  }
  0xb6   : > { %1673 = vmatpush1.bf16.msra.mxu0 %v4005_v29  ;;  %v4096_v29 = vld [vmem:[%s4633_s24 + $0x4ac] ss:$16 sps:$4 sm:$0xff]  }
  0xb7   : > { %1751 = vmatpush1.bf16.msra.mxu1 %v4002_v28  ;;  %1674 = vmatprep.subr.bf16.mxu0 %v4013_v31  ;;  %v4088_v28 = vld [vmem:[%s4633_s24 + $0x4c8] ss:$16 sps:$4 sm:$0xff]  }
  0xb8   : > { %1752 = vmatprep.subr.bf16.mxu1 %v4010_v30  ;;  %v4099_v30 = vld [vmem:[%s4633_s24 + $0x26c] ss:$16 sps:$4 sm:$0xff]   ;;  %v4094_v31 = vld [vmem:[%s4633_s24 + $0x4a8] ss:$16 sps:$4 sm:$0xff]  }
  0xba   : > { %1675 = vmatpush1.bf16.msra.mxu0 %v4011_v35  ;;  %v4100_v35 = vld [vmem:[%s4633_s24 + $0x488] ss:$16 sps:$4 sm:$0xff]  }
  0xbb   : > { %1753 = vmatpush1.bf16.msra.mxu1 %v4008_v34  ;;  %1676 = vmatprep.subr.bf16.mxu0 %v4019_v37  ;;  %v4105_v34 = vld [vmem:[%s4633_s24 + $0x24c] ss:$16 sps:$4 sm:$0xff]  }
  0xbc   : > { %1754 = vmatprep.subr.bf16.mxu1 %v4016_v36  ;;  %v4103_v36 = vld [vmem:[%s4633_s24 + $0x248] ss:$16 sps:$4 sm:$0xff]   ;;  %v4111_v37 = vld [vmem:[%s4633_s24 + $0x22c] ss:$16 sps:$4 sm:$0xff]  }
  0xbe   : > { %1677 = vmatpush1.bf16.msra.mxu0 %v4017_v39  ;;  %v4109_v39 = vld [vmem:[%s4633_s24 + $0x228] ss:$16 sps:$4 sm:$0xff]  }
  0xbf   : > { %1755 = vmatpush1.bf16.msra.mxu1 %v4014_v38  ;;  %1678 = vmatprep.subr.bf16.mxu0 %v4025_v41  ;;  %v4106_v38 = vld [vmem:[%s4633_s24 + $0x468] ss:$16 sps:$4 sm:$0xff]   ;;  %v4117_v41 = vld [vmem:[%s4633_s24 + $0x20c] ss:$16 sps:$4 sm:$0xff]  }
  0xc0   : > { %1756 = vmatprep.subr.bf16.mxu1 %v4022_v40  ;;  %v4114_v40 = vld [vmem:[%s4633_s24 + $0x44c] ss:$16 sps:$4 sm:$0xff]  }
  0xc2   : > { %1679 = vmatpush2.bf16.msra.mxu0 %v4023_v43  ;;  %v4115_v43 = vld [vmem:[%s4633_s24 + $0x208] ss:$16 sps:$4 sm:$0xff]  }
  0xc3   : > { %1757 = vmatpush1.bf16.msra.mxu1 %v4020_v42  ;;  %1680 = vmatprep.subr.bf16.mxu0 %v4031_v45  ;;  %v4112_v42 = vld [vmem:[%s4633_s24 + $0x448] ss:$16 sps:$4 sm:$0xff]   ;;  %v4123_v45 = vld [vmem:[%s4633_s24 + $0x3ec] ss:$16 sps:$4 sm:$0xff]  }
  0xc4   : > { %1758 = vmatprep.subr.bf16.mxu1 %v4028_v44  ;;  %v4120_v44 = vld [vmem:[%s4633_s24 + $0x42c] ss:$16 sps:$4 sm:$0xff]  }
  0xc6   : > { %1681 = vmatpush2.bf16.msra.mxu0 %v4029_v47  ;;  %v4121_v47 = vld [vmem:[%s4633_s24 + $0x3e8] ss:$16 sps:$4 sm:$0xff]  }
  0xc7   : > { %1759 = vmatpush1.bf16.msra.mxu1 %v4026_v46  ;;  %1682 = vmatprep.subr.bf16.mxu0 %v4037_v49  ;;  %v4118_v46 = vld [vmem:[%s4633_s24 + $0x428] ss:$16 sps:$4 sm:$0xff]   ;;  %v4129_v49 = vld [vmem:[%s4633_s24 + $0x3cc] ss:$16 sps:$4 sm:$0xff]  }
  0xc8   : > { %1760 = vmatprep.subr.bf16.mxu1 %v4034_v48  ;;  %v4126_v48 = vld [vmem:[%s4633_s24 + $0x40c] ss:$16 sps:$4 sm:$0xff]  }
  0xca   : > { %1683 = vmatpush2.bf16.msra.mxu0 %v4035_v52  ;;  %v4127_v52 = vld [vmem:[%s4633_s24 + $0x3c8] ss:$16 sps:$4 sm:$0xff]  }
  0xcb   : > { %1761 = vmatpush2.bf16.msra.mxu1 %v4032_v50  ;;  %1684 = vmatprep.subr.bf16.mxu0 %v4043_v54  ;;  %v4124_v50 = vld [vmem:[%s4633_s24 + $0x408] ss:$16 sps:$4 sm:$0xff]   ;;  %v4135_v54 = vld [vmem:[%s4633_s24 + $0x3ac] ss:$16 sps:$4 sm:$0xff]  }
  0xcc   : > { %1762 = vmatprep.subr.bf16.mxu1 %v4040_v53  ;;  %v4132_v53 = vld [vmem:[%s4633_s24 + $0x5ec] ss:$16 sps:$4 sm:$0xff]  }
  0xce   : > { %1685 = vmatpush2.bf16.msra.mxu0 %v4041_v56  ;;  %v4133_v56 = vld [vmem:[%s4633_s24 + $0x3a8] ss:$16 sps:$4 sm:$0xff]  }
  0xcf   : > { %1763 = vmatpush2.bf16.msra.mxu1 %v4038_v55  ;;  %1686 = vmatprep.subr.bf16.mxu0 %v4049_v58  ;;  %v4130_v55 = vld [vmem:[%s4633_s24 + $0x5e8] ss:$16 sps:$4 sm:$0xff]   ;;  %v4141_v58 = vld [vmem:[%s4633_s24 + $0x38c] ss:$16 sps:$4 sm:$0xff]  }
  0xd0   : > { %1764 = vmatprep.subr.bf16.mxu1 %v4046_v57  ;;  %v4138_v57 = vld [vmem:[%s4633_s24 + $0x5cc] ss:$16 sps:$4 sm:$0xff]  }
  0xd2   : > { %1687 = vmatpush2.bf16.msra.mxu0 %v4047_v60  ;;  %v4139_v60 = vld [vmem:[%s4633_s24 + $0x388] ss:$16 sps:$4 sm:$0xff]  }
  0xd3   : > { %1765 = vmatpush2.bf16.msra.mxu1 %v4044_v59  ;;  %1688 = vmatprep.subr.bf16.mxu0 %v4055_v62  ;;  %v4136_v59 = vld [vmem:[%s4633_s24 + $0x5c8] ss:$16 sps:$4 sm:$0xff]   ;;  %v4147_v62 = vld [vmem:[%s4633_s24 + $0x36c] ss:$16 sps:$4 sm:$0xff]  }
  0xd4   : > { %1766 = vmatprep.subr.bf16.mxu1 %v4052_v61  ;;  %v4144_v61 = vld [vmem:[%s4633_s24 + $0x5ac] ss:$16 sps:$4 sm:$0xff]  }
  0xd6   : > { %1689 = vmatpush2.bf16.msra.mxu0 %v4053_v0  ;;  %v4145_v0 = vld [vmem:[%s4633_s24 + $0x368] ss:$16 sps:$4 sm:$0xff]  }
  0xd7   : > { %1767 = vmatpush2.bf16.msra.mxu1 %v4050_v63  ;;  %1690 = vmatprep.subr.bf16.mxu0 %v4061_v2  ;;  %v4142_v63 = vld [vmem:[%s4633_s24 + $0x5a8] ss:$16 sps:$4 sm:$0xff]   ;;  %v4153_v2 = vld [vmem:[%s4633_s24 + $0x34c] ss:$16 sps:$4 sm:$0xff]  }
  0xd8   : > { %1768 = vmatprep.subr.bf16.mxu1 %v4058_v1  ;;  %v4150_v1 = vld [vmem:[%s4633_s24 + $0x58c] ss:$16 sps:$4 sm:$0xff]  }
  0xda   : > { %1691 = vmatpush2.bf16.msra.mxu0 %v4059_v4  ;;  %v4151_v4 = vld [vmem:[%s4633_s24 + $0x348] ss:$16 sps:$4 sm:$0xff]  }
  0xdb   : > { %1769 = vmatpush2.bf16.msra.mxu1 %v4056_v3  ;;  %1692 = vmatprep.subr.bf16.mxu0 %v4067_v8  ;;  %v4148_v3 = vld [vmem:[%s4633_s24 + $0x588] ss:$16 sps:$4 sm:$0xff]   ;;  %v4159_v8 = vld [vmem:[%s4633_s24 + $0x32c] ss:$16 sps:$4 sm:$0xff]  }
  0xdc   : > { %1770 = vmatprep.subr.bf16.mxu1 %v4064_v5  ;;  %v4156_v5 = vld [vmem:[%s4633_s24 + $0x56c] ss:$16 sps:$4 sm:$0xff]  }
  0xde   : > { %1693 = vmatpush2.bf16.msra.mxu0 %v4065_v10  ;;  %v4157_v10 = vld [vmem:[%s4633_s24 + $0x328] ss:$16 sps:$4 sm:$0xff]  }
  0xdf   : > { %1771 = vmatpush2.bf16.msra.mxu1 %v4062_v9  ;;  %1785 = vmatprep.subr.bf16.mxu0 %v4075_v12  ;;  %v4154_v9 = vld [vmem:[%s4633_s24 + $0x568] ss:$16 sps:$4 sm:$0xff]   ;;  %v4165_v12 = vld [vmem:[%s4633_s24 + $0x30c] ss:$16 sps:$4 sm:$0xff]  }
  0xe0   : > { %1772 = vmatprep.subr.bf16.mxu1 %v4072_v11  ;;  %v4162_v11 = vld [vmem:[%s4633_s24 + $0x54c] ss:$16 sps:$4 sm:$0xff]  }
  0xe1   : > { %1695 = vmatmul.mubr.bf16.vlgmr.msra.gmra.mxu0 %v4814_v14 }
  0xe2   : > { %1786 = vmatpush1.bf16.msra.mxu0 %v4073_v16  ;;  %1817 = vmatprep.mubr.bf16.mxu0 %v4703_v51  ;;  %v4091_v51 = vld [vmem:[%s4633_s24 + $0x288] ss:$16 sps:$4 sm:$0xff]  }
  0xe3   : > { %1773 = vmatpush2.bf16.msra.mxu1 %v4070_v15  ;;  %1787 = vmatprep.subr.bf16.mxu0 %v4081_v19  ;;  %v4160_v15 = vld [vmem:[%s4633_s24 + $0x548] ss:$16 sps:$4 sm:$0xff]   ;;  %v4171_v19 = vld [vmem:[%s4633_s24 + $0x60c] ss:$16 sps:$4 sm:$0xff]  }
  0xe4   : > { %1774 = vmatprep.subr.bf16.mxu1 %v4078_v18  ;;  %v4163_v16 = vld [vmem:[%s4633_s24 + $0x308] ss:$16 sps:$4 sm:$0xff]   ;;  %v4168_v18 = vld [vmem:[%s4633_s24 + $0x52c] ss:$16 sps:$4 sm:$0xff]  }
  0xe6   : > { %1788 = vmatpush1.bf16.msra.mxu0 %v4079_v21  ;;  %v4169_v21 = vld [vmem:[%s4633_s24 + $0x608] ss:$16 sps:$4 sm:$0xff]  }
  0xe7   : > { %1775 = vmatpush2.bf16.msra.mxu1 %v4076_v20  ;;  %1789 = vmatprep.subr.bf16.mxu0 %v4087_v23  ;;  %v4166_v20 = vld [vmem:[%s4633_s24 + $0x528] ss:$16 sps:$4 sm:$0xff]  }
  0xe8   : > { %1826 = vmatprep.subr.bf16.mxu1 %v4084_v22  ;;  %v4174_v22 = vld [vmem:[%s4633_s24 + $0x50c] ss:$16 sps:$4 sm:$0xff]   ;;  %v4172_v23 = vld [vmem:[%s4633_s24 + $0x508] ss:$16 sps:$4 sm:$0xff]  }
  0xea   : > { %1777 = vmatmul.mubr.bf16.vlgmr.msra.gmra.mxu1 %v4725_v6  ;;  %1790 = vmatpush1.bf16.msra.mxu0 %v4085_v25  ;;  %v4097_v6 = vld [vmem:[%s4633_s24 + $0x268] ss:$16 sps:$4 sm:$0xff]  }
  0xeb   : > { %1827 = vmatpush1.bf16.msra.mxu1 %v4082_v24  ;;  %1791 = vmatprep.subr.bf16.mxu0 %v4093_v27 }
  0xec   : > { %1828 = vmatprep.subr.bf16.mxu1 %v4090_v26  ;;  %1858 = vmatprep.mubr.bf16.mxu1 %v4769_v33  ;;  %v4108_v33 = vld [vmem:[%s4633_s24 + $0x46c] ss:$16 sps:$4 sm:$0xff]  }
  0xee   : > { %1792 = vmatpush1.bf16.msra.mxu0 %v4091_v51 }
  0xef   : > { %1829 = vmatpush1.bf16.msra.mxu1 %v4088_v28  ;;  %1793 = vmatprep.subr.bf16.mxu0 %v4099_v30 }
  0xf0   : > { %1830 = vmatprep.subr.bf16.mxu1 %v4096_v29 }
  0xf2   : > { %1794 = vmatpush1.bf16.msra.mxu0 %v4097_v6 }
  0xf3   : > { %1831 = vmatpush1.bf16.msra.mxu1 %v4094_v31  ;;  %1795 = vmatprep.subr.bf16.mxu0 %v4105_v34  ;;  %v4905_v34 = vld [vmem:[%s4902_s21] sm:$0x77] }
  0xf4   : > { %1832 = vmatprep.subr.bf16.mxu1 %v4102_v32 }
  0xf6   : > { %1796 = vmatpush1.bf16.msra.mxu0 %v4103_v36 }
  0xf7   : > { %1833 = vmatpush1.bf16.msra.mxu1 %v4100_v35  ;;  %1797 = vmatprep.subr.bf16.mxu0 %v4111_v37 }
  0xf8   : > { %1834 = vmatprep.subr.bf16.mxu1 %v4108_v33 }
  0xfa   : > { %1798 = vmatpush1.bf16.msra.mxu0 %v4109_v39 }
  0xfb   : > { %1835 = vmatpush1.bf16.msra.mxu1 %v4106_v38  ;;  %1799 = vmatprep.subr.bf16.mxu0 %v4117_v41 }
  0xfc   : > { %1836 = vmatprep.subr.bf16.mxu1 %v4114_v40 }
  0xfe   : > { %1800 = vmatpush1.bf16.msra.mxu0 %v4115_v43 }
  0xff   : > { %1837 = vmatpush1.bf16.msra.mxu1 %v4112_v42  ;;  %1801 = vmatprep.subr.bf16.mxu0 %v4123_v45 }
 0x100   : > { %1838 = vmatprep.subr.bf16.mxu1 %v4120_v44 }
 0x102   : > { %1802 = vmatpush2.bf16.msra.mxu0 %v4121_v47 }
 0x103   : > { %1839 = vmatpush1.bf16.msra.mxu1 %v4118_v46  ;;  %1803 = vmatprep.subr.bf16.mxu0 %v4129_v49 }
 0x104   : > { %1840 = vmatprep.subr.bf16.mxu1 %v4126_v48 }
 0x106   : > { %1804 = vmatpush2.bf16.msra.mxu0 %v4127_v52 }
 0x107   : > { %1841 = vmatpush1.bf16.msra.mxu1 %v4124_v50  ;;  %1805 = vmatprep.subr.bf16.mxu0 %v4135_v54 }
 0x108   : > { %1842 = vmatprep.subr.bf16.mxu1 %v4132_v53 }
 0x10a   : > { %1806 = vmatpush2.bf16.msra.mxu0 %v4133_v56 }
 0x10b   : > { %1843 = vmatpush2.bf16.msra.mxu1 %v4130_v55  ;;  %1807 = vmatprep.subr.bf16.mxu0 %v4141_v58 }
 0x10c   : > { %1844 = vmatprep.subr.bf16.mxu1 %v4138_v57 }
 0x10e   : > { %1808 = vmatpush2.bf16.msra.mxu0 %v4139_v60 }
 0x10f   : > { %1845 = vmatpush2.bf16.msra.mxu1 %v4136_v59  ;;  %1809 = vmatprep.subr.bf16.mxu0 %v4147_v62 }
 0x110   : > { %1846 = vmatprep.subr.bf16.mxu1 %v4144_v61 }
 0x112   : > { %1810 = vmatpush2.bf16.msra.mxu0 %v4145_v0 }
 0x113   : > { %1847 = vmatpush2.bf16.msra.mxu1 %v4142_v63  ;;  %1811 = vmatprep.subr.bf16.mxu0 %v4153_v2 }
 0x114   : > { %1848 = vmatprep.subr.bf16.mxu1 %v4150_v1 }
 0x116   : > { %1812 = vmatpush2.bf16.msra.mxu0 %v4151_v4 }
 0x117   : > { %1849 = vmatpush2.bf16.msra.mxu1 %v4148_v3  ;;  %1813 = vmatprep.subr.bf16.mxu0 %v4159_v8 }
 0x118   : > { %1850 = vmatprep.subr.bf16.mxu1 %v4156_v5 }
 0x11a   : > { %1814 = vmatpush2.bf16.msra.mxu0 %v4157_v10 }
 0x11b   : > { %1851 = vmatpush2.bf16.msra.mxu1 %v4154_v9  ;;  %1815 = vmatprep.subr.bf16.mxu0 %v4165_v12 }
 0x11c   : > { %1852 = vmatprep.subr.bf16.mxu1 %v4162_v11 }
 0x11e   : > { %1816 = vmatpush2.bf16.msra.mxu0 %v4163_v16 }
 0x11f   : > { %1853 = vmatpush2.bf16.msra.mxu1 %v4160_v15  ;;  %1881 = vmatprep.subr.bf16.mxu0 %v4171_v19 }
 0x120   : > { %1854 = vmatprep.subr.bf16.mxu1 %v4168_v18 }
 0x121   : > { %1818 = vmatmul.mubr.bf16.vlgmr.msra.gmra.mxu0 %v4727_v7 }
 0x122   : > { %1882 = vmatpush1.bf16.msra.mxu0 %v4169_v21  ;;  %1899 = vmatprep.mubr.bf16.mxu0 %v4464_v13  ;;  %v536_v13 = vlaneseq }
 0x123   : > { %1855 = vmatpush2.bf16.msra.mxu1 %v4166_v20 }
 0x124   : > { %1856 = vmatprep.subr.bf16.mxu1 %v4174_v22 }
 0x127   : > { %1857 = vmatpush2.bf16.msra.mxu1 %v4172_v23 }
 0x129   : > { %3513 = vmatmul.mubr.msk.bf16.vlgmr.msra.gmra.mxu0 %vm1576_vm0, %v4743_v17 }
 0x12a   : > { %1859 = vmatmul.mubr.bf16.vlgmr.msra.gmra.mxu1 %v4814_v14  ;;  %v4897_v14 = vshrl.u32 %v536_v13, 7 }
 0x12c   : > { %v4900_v17 = vsub.s32 0, %v4897_v14  ;;  %v542_v35 = vsub.s32 4, %v4897_v14  ;;  %v4926_v13 = vsub.s32 2, %v4897_v14 }
 0x12e   : > { %v539_v36 = vrot.slane %v4905_v34, %v4900_v17  ;;  %v543_v33 = vrot.slane %v4905_v34, %v542_v35 }
 0x130   : > { %v559_v37 = vrot.slane %v539_v36, %v4900_v17  ;;  %v563_v38 = vrot.slane %v543_v33, %v4900_v17  ;;  %v2035_v33 = vsub.s32 6, %v4897_v14 }
 0x161   : > { %v1614_v24 = vpop.f32.mrf.mxu0 }
 0x162   : > { %v1655_v25 = vpop.f32.mrf.mxu1  ;;  %v1615_v39 = vadd.f32 %v1614_v24, %v559_v37 }
 0x163   : > { %v1616_v26 = vpop.f32.mrf.mxu0 }
 0x164   : > { %v1657_v27 = vpop.f32.mrf.mxu1  ;;  %v1617_v40 = vadd.f32 %v1616_v26, %v563_v38  ;;  %v1656_v41 = vadd.f32 %v1655_v25, %v1615_v39  ;;  %v2032_v38 = vrot.slane %v4905_v34, %v4926_v13 }
 0x165   : > { %v1618_v28 = vpop.f32.mrf.mxu0 }
 0x166   : > { %v1659_v51 = vpop.f32.mrf.mxu1  ;;  %v1658_v43 = vadd.f32 %v1657_v27, %v1617_v40  ;;  %v2036_v40 = vrot.slane %v4905_v34, %v2035_v33 }
 0x167   : > { %v1619_v7 = vpop.f32.mrf.mxu0 }
 0x168   : > { %v1660_v29 = vpop.f32.mrf.mxu1 }
 0x16a   : > { %v1737_v30 = vpop.f32.mrf.mxu1 }
 0x16c   : > { %v1739_v31 = vpop.f32.mrf.mxu1 }
 0x16e   : > { %v1741_v6 = vpop.f32.mrf.mxu1 }
 0x16f   : > { %v1983_v6 = vsub.s32 5, %v4897_v14 }
 0x170   : > { %v1742_v32 = vpop.f32.mrf.mxu1 }
 0x171   : > { %v1984_v36 = vrot.slane %v4905_v34, %v1983_v6 }
 0x1a1   : > { %v1696_v42 = vpop.f32.mrf.mxu0 }
 0x1a2   : > { %v1697_v44 = vadd.f32 %v1696_v42, %v1656_v41  ;;  %v2052_v42 = vrot.slane %v2032_v38, %v4926_v13 }
 0x1a3   : > { %v1698_v45 = vpop.f32.mrf.mxu0 }
 0x1a4   : > { %v1738_v46 = vadd.f32 %v1737_v30, %v1697_v44  ;;  %v1699_v47 = vadd.f32 %v1698_v45, %v1658_v43  ;;  %v4920_v30 = vsub.s32 1, %v4897_v14 }
 0x1a5   : > { %v1700_v48 = vpop.f32.mrf.mxu0 }
 0x1a6   : > { %v1908_v49 = vmax.f32 %v1738_v46, 0.0  ;;  %v1740_v50 = vadd.f32 %v1739_v31, %v1699_v47  ;;  %v1980_v32 = vrot.slane %v4905_v34, %v4920_v30  ;;  %v2004_v39 = vrot.slane %v1984_v36, %v4920_v30 }
 0x1a7   : > { %v1701_v52 = vpop.f32.mrf.mxu0  ;;  %v2056_v46 = vrot.slane %v2036_v40, %v4926_v13 }
 0x1a8   : > { %v1912_v53 = vrot.slane %v1908_v49, 4  ;;  %v1909_v54 = vmax.f32 %v1740_v50, 0.0  ;;  %v2000_v37 = vrot.slane %v1980_v32, %v4920_v30  ;;  %v4943_v50 = vld [vmem:[%s4902_s21 + $0x8] sm:$0x77] }
 0x1a9   : > { %v547_v52 = vrot.slane %v4943_v50, %v4900_v17 }
 0x1aa   : > { %v4915_v55 = vpop.f32.mrf.mxu1  ;;  %v1913_v56 = vadd.f32 %v1912_v53, %v1908_v49  ;;  %v1918_v57 = vrot.slane %v1909_v54, 4  ;;  %v551_v53 = vrot.slane %v4943_v50, %v542_v35 }
 0x1ac   : > { %v4917_v58 = vpop.f32.mrf.mxu1  ;;  %v1914_v59 = vrot.slane %v1913_v56, 2  ;;  %v1919_v60 = vadd.f32 %v1918_v57, %v1909_v54 }
 0x1ae   : > { %v1782_v61 = vpop.f32.mrf.mxu1  ;;  %v1915_v62 = vadd.f32 %v1914_v59, %v1913_v56  ;;  %v1920_v63 = vrot.slane %v1919_v60, 2  ;;  %v567_v56 = vrot.slane %v547_v52, %v4900_v17  ;;  %v571_v59 = vrot.slane %v551_v53, %v4900_v17 }
 0x1b0   : > { %v1783_v0 = vpop.f32.mrf.mxu1  ;;  %v1916_v1 = vrot.slane %v1915_v62, 1  ;;  %v1921_v2 = vadd.f32 %v1920_v63, %v1919_v60  ;;  %v1779_v61 = vadd.f32 %v4915_v55, %v567_v56  ;;  %v1781_v63 = vadd.f32 %v4917_v58, %v571_v59 }
 0x1b1   : > { %v1988_v56 = vrot.slane %v4943_v50, %v4920_v30 }
 0x1b2   : > { %v1917_v3 = vadd.f32 %v1916_v1, %v1915_v62  ;;  %v1922_v4 = vrot.slane %v1921_v2, 1 }
 0x1b3   : > { %v2008_v59 = vrot.slane %v1988_v56, %v4920_v30 }
 0x1b4   : > { %v1937_v5 = vmul.f32 0.125, %v1917_v3  ;;  %v1923_v8 = vadd.f32 %v1922_v4, %v1921_v2 }
 0x1b6   : > { %v1941_v9 = vsub.f32 %v1908_v49, %v1937_v5  ;;  %v1938_v10 = vmul.f32 0.125, %v1923_v8 }
 0x1b8   : > { %v1945_v11 = vmul.f32 %v1941_v9, %v1941_v9  ;;  %v1942_v12 = vsub.f32 %v1909_v54, %v1938_v10  ;;  %v2013_v41 = vmul.f32 %v2000_v37, %v1941_v9 }
 0x1ba   : > { %v1949_v15 = vrot.slane %v1945_v11, 4  ;;  %v1946_v16 = vmul.f32 %v1942_v12, %v1942_v12  ;;  %v2014_v45 = vmul.f32 %v2004_v39, %v1942_v12 }
 0x1bc   : > { %v1950_v18 = vadd.f32 %v1949_v15, %v1945_v11  ;;  %v1955_v19 = vrot.slane %v1946_v16, 4 }
 0x1be   : > { %v1951_v20 = vrot.slane %v1950_v18, 2  ;;  %v1956_v21 = vadd.f32 %v1955_v19, %v1946_v16 }
 0x1c0   : > { %v1952_v22 = vadd.f32 %v1951_v20, %v1950_v18  ;;  %v1957_v23 = vrot.slane %v1956_v21, 2 }
 0x1c2   : > { %v1953_v24 = vrot.slane %v1952_v22, 1  ;;  %v1958_v25 = vadd.f32 %v1957_v23, %v1956_v21 }
 0x1c4   : > { %v1954_v26 = vadd.f32 %v1953_v24, %v1952_v22  ;;  %v1959_v27 = vrot.slane %v1958_v25, 1 }
 0x1c6   : > { %v1973_v28 = vmul.f32 0.125, %v1954_v26  ;;  %v1960_v51 = vadd.f32 %v1959_v27, %v1958_v25 }
 0x1c8   : > { %v2017_v7 = vadd.f32 1e-05, %v1973_v28  ;;  %v1974_v29 = vmul.f32 0.125, %v1960_v51 }
 0x1ca   : > { %4175 = vrsqrt.f32 %v2017_v7  ;;  %v2018_v31 = vadd.f32 1e-05, %v1974_v29 }
 0x1cc   : > { %4177 = vrsqrt.f32 %v2018_v31 }
 0x1d7   : > { %v4176_v43 = vpop.eup %4175 }
 0x1d8   : > { %v2025_v44 = vmul.f32 %v4176_v43, %v2013_v41 }
 0x1d9   : > { %v4178_v47 = vpop.eup %4177 }
 0x1da   : > { %v2065_v48 = vadd.f32 %v2052_v42, %v2025_v44  ;;  %v2026_v49 = vmul.f32 %v4178_v47, %v2014_v45 }
 0x1dc   : > { %2071 = vst [vmem:[%s4945_s22] sm:$0xff] %v2065_v48  ;;  %v2066_v34 = vadd.f32 %v2056_v46, %v2026_v49 }
 0x1de   : > { %2072 = vst [vmem:[%s4945_s22 + $0x8] sm:$0xff] %v2066_v34 }
 0x1e1   : > { %v1819_v54 = vpop.f32.mrf.mxu0 }
 0x1e2   : > { %v1820_v0 = vadd.f32 %v1819_v54, %v1779_v61 }
 0x1e3   : > { %v1821_v57 = vpop.f32.mrf.mxu0 }
 0x1e4   : > { %v1822_v3 = vadd.f32 %v1821_v57, %v1781_v63  ;;  %v1992_v57 = vrot.slane %v4943_v50, %v1983_v6 }
 0x1e5   : > { %v1823_v60 = vpop.f32.mrf.mxu0 }
 0x1e6   : > { %v2040_v60 = vrot.slane %v4943_v50, %v4926_v13  ;;  %v2012_v61 = vrot.slane %v1992_v57, %v4920_v30 }
 0x1e7   : > { %v1824_v62 = vpop.f32.mrf.mxu0 }
 0x1e8   : > { %v2044_v62 = vrot.slane %v4943_v50, %v2035_v33 }
 0x1e9   : > { %v1901_v2 = vpop.f32.mrf.mxu0 }
 0x1ea   : > { %v1860_v1 = vpop.f32.mrf.mxu1  ;;  %v2064_v6 = vrot.slane %v2044_v62, %v4926_v13 }
 0x1eb   : > { %v1861_v4 = vadd.f32 %v1860_v1, %v1820_v0  ;;  %v1903_v8 = vpop.f32.mrf.mxu0  ;;  %v2060_v0 = vrot.slane %v2040_v60, %v4926_v13 }
 0x1ec   : > { %v1862_v5 = vpop.f32.mrf.mxu1 }
 0x1ed   : > { %v1902_v35 = vadd.f32 %v1901_v2, %v1861_v4  ;;  %v1863_v9 = vadd.f32 %v1862_v5, %v1822_v3  ;;  %v1905_v11 = vpop.f32.mrf.mxu0 }
 0x1ee   : > { %v1864_v10 = vpop.f32.mrf.mxu1 }
 0x1ef   : > { %v1910_v12 = vmax.f32 %v1902_v35, 0.0  ;;  %v1904_v15 = vadd.f32 %v1903_v8, %v1863_v9  ;;  %v1906_v18 = vpop.f32.mrf.mxu0 }
 0x1f0   : > { %v1865_v16 = vpop.f32.mrf.mxu1 }
 0x1f1   : > { %v1924_v19 = vrot.slane %v1910_v12, 4  ;;  %v1911_v55 = vmax.f32 %v1904_v15, 0.0 }
 0x1f3   : > { %v1925_v20 = vadd.f32 %v1924_v19, %v1910_v12  ;;  %v1930_v21 = vrot.slane %v1911_v55, 4 }
 0x1f5   : > { %v1926_v58 = vrot.slane %v1925_v20, 2  ;;  %v1931_v22 = vadd.f32 %v1930_v21, %v1911_v55 }
 0x1f7   : > { %v1927_v23 = vadd.f32 %v1926_v58, %v1925_v20  ;;  %v1932_v24 = vrot.slane %v1931_v22, 2 }
 0x1f9   : > { %v1928_v25 = vrot.slane %v1927_v23, 1  ;;  %v1933_v26 = vadd.f32 %v1932_v24, %v1931_v22 }
 0x1fb   : > { %v1929_v27 = vadd.f32 %v1928_v25, %v1927_v23  ;;  %v1934_v28 = vrot.slane %v1933_v26, 1 }
 0x1fd   : > { %v1939_v51 = vmul.f32 0.125, %v1929_v27  ;;  %v1935_v7 = vadd.f32 %v1934_v28, %v1933_v26 }
 0x1ff   : > { %v1943_v29 = vsub.f32 %v1910_v12, %v1939_v51  ;;  %v1940_v31 = vmul.f32 0.125, %v1935_v7 }
 0x201   : > { %v1947_v32 = vmul.f32 %v1943_v29, %v1943_v29  ;;  %v1944_v36 = vsub.f32 %v1911_v55, %v1940_v31  ;;  %v2015_v63 = vmul.f32 %v2008_v59, %v1943_v29 }
 0x203   : > { %v1961_v37 = vrot.slane %v1947_v32, 4  ;;  %v1948_v38 = vmul.f32 %v1944_v36, %v1944_v36  ;;  %v2016_v3 = vmul.f32 %v2012_v61, %v1944_v36 }
 0x205   : > { %v1962_v39 = vadd.f32 %v1961_v37, %v1947_v32  ;;  %v1967_v40 = vrot.slane %v1948_v38, 4 }
 0x207   : > { %v1963_v41 = vrot.slane %v1962_v39, 2  ;;  %v1968_v42 = vadd.f32 %v1967_v40, %v1948_v38 }
 0x209   : > { %v1964_v43 = vadd.f32 %v1963_v41, %v1962_v39  ;;  %v1969_v44 = vrot.slane %v1968_v42, 2 }
 0x20b   : > { %v1965_v45 = vrot.slane %v1964_v43, 1  ;;  %v1970_v46 = vadd.f32 %v1969_v44, %v1968_v42 }
 0x20d   : > { %v1966_v47 = vadd.f32 %v1965_v45, %v1964_v43  ;;  %v1971_v48 = vrot.slane %v1970_v46, 1 }
 0x20f   : > { %v1975_v49 = vmul.f32 0.125, %v1966_v47  ;;  %v1972_v34 = vadd.f32 %v1971_v48, %v1970_v46 }
 0x211   : > { %v2019_v52 = vadd.f32 1e-05, %v1975_v49  ;;  %v1976_v53 = vmul.f32 0.125, %v1972_v34 }
 0x213   : > { %4179 = vrsqrt.f32 %v2019_v52  ;;  %v2020_v54 = vadd.f32 1e-05, %v1976_v53 }
 0x215   : > { %4181 = vrsqrt.f32 %v2020_v54 }
 0x220   : > { %v4180_v1 = vpop.eup %4179 }
 0x221   : > { %v2027_v2 = vmul.f32 %v4180_v1, %v2015_v63 }
 0x222   : > { %v4182_v4 = vpop.eup %4181 }
 0x223   : > { %v2067_v5 = vadd.f32 %v2060_v0, %v2027_v2  ;;  %v2028_v8 = vmul.f32 %v4182_v4, %v2016_v3  ;;  %2078 = sbr.rel (%p3515_p8) target bundleno = 1576 (0x628), region = 64 }
 0x225   : > { %2073 = vst [vmem:[%s4945_s22 + $0x10] sm:$0xff] %v2067_v5  ;;  %v2068_v35 = vadd.f32 %v2064_v6, %v2028_v8 }
 0x227   : > { %2074 = vst [vmem:[%s4945_s22 + $0x18] sm:$0xff] %v2068_v35 }
 0x228   : > { %v4183_v14 = vld [vmem:[#allocation7 + $0x78] sm:$0xff]   ;;  %v4187_v10 = vld [vmem:[#allocation7 + $0x70] sm:$0xff]   ;;  %v4191_v16 = vld [vmem:[#allocation7 + $0x68] sm:$0xff]   ;;  %vm4466_vm1 = vmmov 0  }
 0x229   : > { %v4184_v9 = vld [vmem:[#allocation7 + $0xf8] sm:$0xff]   ;;  %3612 = vmatprep.subr.bf16.mxu0 %v4183_v14  ;;  %v4188_v11 = vld [vmem:[#allocation7 + $0xf0] sm:$0xff]   ;;  %v4192_v18 = vld [vmem:[#allocation7 + $0xe8] sm:$0xff]  }
 0x22a   : > { %v4185_v33 = vld [vmem:[#allocation7 + $0x38] sm:$0xff]   ;;  %3634 = vmatprep.subr.bf16.mxu1 %v4184_v9  ;;  %v4189_v12 = vld [vmem:[#allocation7 + $0x30] sm:$0xff]   ;;  %v4193_v19 = vld [vmem:[#allocation7 + $0x28] sm:$0xff]  }
 0x22b   : > { %v4186_v50 = vld [vmem:[#allocation7 + $0xb8] sm:$0xff]   ;;  %3613 = vmatpush3.bf16.msra.mxu0 %v4185_v33  ;;  %v4190_v15 = vld [vmem:[#allocation7 + $0xb0] sm:$0xff]   ;;  %v4194_v55 = vld [vmem:[#allocation7 + $0xa8] sm:$0xff]  }
 0x22c   : > { %3635 = vmatpush3.bf16.msra.mxu1 %v4186_v50  ;;  %3614 = vmatprep.subr.bf16.mxu0 %v4187_v10  ;;  %v4195_v20 = vld [vmem:[#allocation7 + $0x60] sm:$0xff]   ;;  %v4199_v23 = vld [vmem:[#allocation7 + $0x58] sm:$0xff]   ;;  %v4203_v27 = vld [vmem:[#allocation7 + $0x50] sm:$0xff]  }
 0x22d   : > { %3636 = vmatprep.subr.bf16.mxu1 %v4188_v11  ;;  %v4196_v21 = vld [vmem:[#allocation7 + $0xe0] sm:$0xff]   ;;  %v4200_v24 = vld [vmem:[#allocation7 + $0xd8] sm:$0xff]   ;;  %v4204_v28 = vld [vmem:[#allocation7 + $0xd0] sm:$0xff]  }
 0x22e   : > { %v4197_v58 = vld [vmem:[#allocation7 + $0x20] sm:$0xff]   ;;  %v4201_v25 = vld [vmem:[#allocation7 + $0x18] sm:$0xff]   ;;  %v4205_v51 = vld [vmem:[#allocation7 + $0x10] sm:$0xff]  }
 0x22f   : > { %3615 = vmatpush3.bf16.msra.mxu0 %v4189_v12  ;;  %v4198_v22 = vld [vmem:[#allocation7 + $0xa0] sm:$0xff]   ;;  %v4202_v26 = vld [vmem:[#allocation7 + $0x98] sm:$0xff]   ;;  %v4206_v7 = vld [vmem:[#allocation7 + $0x90] sm:$0xff]  }
 0x230   : > { %3637 = vmatpush3.bf16.msra.mxu1 %v4190_v15  ;;  %3616 = vmatprep.subr.bf16.mxu0 %v4191_v16  ;;  %v4207_v29 = vld [vmem:[#allocation7 + $0x48] sm:$0xff]   ;;  %v4211_v37 = vld [vmem:[#allocation7 + $0x40] sm:$0xff]   ;;  %v2134_v42 = vld [vmem:[#allocation10 + $0x18] sm:$0xff] }
 0x231   : > { %3638 = vmatprep.subr.bf16.mxu1 %v4192_v18  ;;  %v4208_v31 = vld [vmem:[#allocation7 + $0xc8] sm:$0xff]   ;;  %v4212_v38 = vld [vmem:[#allocation7 + $0xc0] sm:$0xff]   ;;  %v2142_v45 = vpack.c.bf16 %v2134_v42, %v2134_v42  ;;  %v2133_v47 = vld [vmem:[#allocation10 + $0x10] sm:$0xff] }
 0x232   : > { %v4209_v32 = vld [vmem:[#allocation7 + $0x8] sm:$0xff]   ;;  %v4213_v39 = vld [vmem:[#allocation7] sm:$0xff]   ;;  %v2141_v48 = vpack.c.bf16 %v2133_v47, %v2133_v47  ;;  %v4215_v49 = vld [vmem:[#allocation7 + $0x178] sm:$0xff]  }
 0x233   : > { %3617 = vmatpush3.bf16.msra.mxu0 %v4193_v19  ;;  %v4210_v36 = vld [vmem:[#allocation7 + $0x88] sm:$0xff]   ;;  %v4214_v40 = vld [vmem:[#allocation7 + $0x80] sm:$0xff]   ;;  %2735 = vmatprep.mubr.bf16.mxu1 %v2142_v45  ;;  %v4216_v34 = vld [vmem:[#allocation7 + $0x1f8] sm:$0xff]  }
 0x234   : > { %3639 = vmatpush3.bf16.msra.mxu1 %v4194_v55  ;;  %3618 = vmatprep.subr.bf16.mxu0 %v4195_v20  ;;  %v2132_v41 = vld [vmem:[#allocation10 + $0x8] sm:$0xff]  ;;  %v2131_v43 = vld [vmem:[#allocation10] sm:$0xff]  ;;  %v4217_v52 = vld [vmem:[#allocation7 + $0x138] sm:$0xff]  }
 0x235   : > { %3640 = vmatprep.subr.bf16.mxu1 %v4196_v21  ;;  %v2140_v44 = vpack.c.bf16 %v2132_v41, %v2132_v41  ;;  %v2139_v46 = vpack.c.bf16 %v2131_v43, %v2131_v43  ;;  %v4218_v53 = vld [vmem:[#allocation7 + $0x1b8] sm:$0xff]   ;;  %v4219_v54 = vld [vmem:[#allocation7 + $0x170] sm:$0xff]   ;;  %v4223_v60 = vld [vmem:[#allocation7 + $0x168] sm:$0xff]  }
 0x236   : > { %v4220_v56 = vld [vmem:[#allocation7 + $0x1f0] sm:$0xff]   ;;  %v4224_v61 = vld [vmem:[#allocation7 + $0x1e8] sm:$0xff]   ;;  %v4227_v0 = vld [vmem:[#allocation7 + $0x160] sm:$0xff]  }
 0x237   : > { %3619 = vmatpush3.bf16.msra.mxu0 %v4197_v58  ;;  %2695 = vmatprep.mubr.bf16.mxu0 %v2140_v44  ;;  %v4221_v57 = vld [vmem:[#allocation7 + $0x130] sm:$0xff]   ;;  %v4225_v62 = vld [vmem:[#allocation7 + $0x128] sm:$0xff]   ;;  %v4228_v1 = vld [vmem:[#allocation7 + $0x1e0] sm:$0xff]  }
 0x238   : > { %3641 = vmatpush3.bf16.msra.mxu1 %v4198_v22  ;;  %3620 = vmatprep.subr.bf16.mxu0 %v4199_v23  ;;  %v4222_v59 = vld [vmem:[#allocation7 + $0x1b0] sm:$0xff]   ;;  %v4226_v63 = vld [vmem:[#allocation7 + $0x1a8] sm:$0xff]   ;;  %v4229_v2 = vld [vmem:[#allocation7 + $0x120] sm:$0xff]  }
 0x239   : > { %3642 = vmatprep.subr.bf16.mxu1 %v4200_v24  ;;  %v4230_v3 = vld [vmem:[#allocation7 + $0x1a0] sm:$0xff]   ;;  %v4231_v6 = vld [vmem:[#allocation7 + $0x158] sm:$0xff]   ;;  %v4235_v35 = vld [vmem:[#allocation7 + $0x150] sm:$0xff]  }
 0x23a   : > { %v4232_v4 = vld [vmem:[#allocation7 + $0x1d8] sm:$0xff]   ;;  %v4236_v14 = vld [vmem:[#allocation7 + $0x1d0] sm:$0xff]   ;;  %v4239_v50 = vld [vmem:[#allocation7 + $0x148] sm:$0xff]  }
 0x23b   : > { %3621 = vmatpush3.bf16.msra.mxu0 %v4201_v25  ;;  %v4233_v5 = vld [vmem:[#allocation7 + $0x118] sm:$0xff]   ;;  %v4237_v9 = vld [vmem:[#allocation7 + $0x110] sm:$0xff]   ;;  %v4240_v10 = vld [vmem:[#allocation7 + $0x1c8] sm:$0xff]  }
 0x23c   : > { %3643 = vmatpush3.bf16.msra.mxu1 %v4202_v26  ;;  %3622 = vmatprep.subr.bf16.mxu0 %v4203_v27  ;;  %v4234_v8 = vld [vmem:[#allocation7 + $0x198] sm:$0xff]   ;;  %v4238_v33 = vld [vmem:[#allocation7 + $0x190] sm:$0xff]   ;;  %v4241_v11 = vld [vmem:[#allocation7 + $0x108] sm:$0xff]   ;;  %v4465_v27 = vmov 0.0  }
 0x23d   : > { %3644 = vmatprep.subr.bf16.mxu1 %v4204_v28  ;;  %v4242_v12 = vld [vmem:[#allocation7 + $0x188] sm:$0xff]   ;;  %v4243_v15 = vld [vmem:[#allocation7 + $0x140] sm:$0xff]   ;;  %v2138_v20 = vld [vmem:[#allocation10 + $0x38] sm:$0xff] }
 0x23e   : > { %v4244_v16 = vld [vmem:[#allocation7 + $0x1c0] sm:$0xff]   ;;  %v2136_v55 = vld [vmem:[#allocation10 + $0x28] sm:$0xff]  ;;  %v2146_v58 = vpack.c.bf16 %v2138_v20, %v2138_v20  ;;  %v2137_v23 = vld [vmem:[#allocation10 + $0x30] sm:$0xff] }
 0x23f   : > { %3623 = vmatpush3.bf16.msra.mxu0 %v4205_v51  ;;  %v4245_v18 = vld [vmem:[#allocation7 + $0x100] sm:$0xff]   ;;  %v2144_v21 = vpack.c.bf16 %v2136_v55, %v2136_v55  ;;  %v2145_v25 = vpack.c.bf16 %v2137_v23, %v2137_v23  ;;  %v4247_v26 = vld [vmem:[#allocation8 + $0x38] sm:$0xff]   ;;  %v4248_v28 = vld [vmem:[#allocation8 + $0x30] sm:$0xff]  }
 0x240   : > { %3645 = vmatpush3.bf16.msra.mxu1 %v4206_v7  ;;  %3624 = vmatprep.subr.bf16.mxu0 %v4207_v29  ;;  %v4246_v19 = vld [vmem:[#allocation7 + $0x180] sm:$0xff]   ;;  %v4249_v51 = vld [vmem:[#allocation8 + $0x28] sm:$0xff]   ;;  %v4251_v29 = vld [vmem:[#allocation8 + $0x18] sm:$0xff]  }
 0x241   : > { %3646 = vmatprep.subr.bf16.mxu1 %v4208_v31  ;;  %v2135_v22 = vld [vmem:[#allocation10 + $0x20] sm:$0xff]  ;;  %v4252_v31 = vld [vmem:[#allocation8 + $0x10] sm:$0xff]  }
 0x242   : > { %v2143_v24 = vpack.c.bf16 %v2135_v22, %v2135_v22  ;;  %v4250_v7 = vld [vmem:[#allocation8 + $0x20] sm:$0xff]  }
 0x243   : > { %3625 = vmatpush3.bf16.msra.mxu0 %v4209_v32  ;;  %v4253_v32 = vld [vmem:[#allocation8 + $0x8] sm:$0xff]   ;;  %v2079_v45 = vld [vmem:[%s5069_s5] sm:$0x7] }
 0x244   : > { %3647 = vmatpush3.bf16.msra.mxu1 %v4210_v36  ;;  %3626 = vmatprep.subr.bf16.mxu0 %v4211_v37  ;;  %v4254_v36 = vld [vmem:[#allocation8] sm:$0xff]   ;;  %v2843_v55 = vrot.slane %v2079_v45, %v4920_v30  ;;  %v2851_v20 = vrot.slane %v2079_v45, %v4926_v13 }
 0x245   : > { %3648 = vmatprep.subr.bf16.mxu1 %v4212_v38 }
 0x247   : > { %3627 = vmatpush3.bf16.msra.mxu0 %v4213_v39 }
 0x248   : > { %3649 = vmatpush3.bf16.msra.mxu1 %v4214_v40  ;;  %3656 = vmatprep.subr.bf16.mxu0 %v4215_v49 }
 0x249   : > { %3678 = vmatprep.subr.bf16.mxu1 %v4216_v34 }
 0x24a   : > { %2696 = vmatmul.mubr.bf16.vlgmr.msra.gmra.mxu0 %v2139_v46  ;;  %v2278_v46 = vrot.slane %v2079_v45, %v4900_v17 }
 0x24b   : > { %2736 = vmatmul.mubr.bf16.vlgmr.msra.gmra.mxu1 %v2141_v48  ;;  %3657 = vmatpush3.bf16.msra.mxu0 %v4217_v52 }
 0x24c   : > { %3679 = vmatpush3.bf16.msra.mxu1 %v4218_v53  ;;  %3658 = vmatprep.subr.bf16.mxu0 %v4219_v54 }
 0x24d   : > { %3680 = vmatprep.subr.bf16.mxu1 %v4220_v56  ;;  %2775 = vmatprep.mubr.bf16.mxu0 %v2144_v21 }
 0x24e   : > { %2815 = vmatprep.mubr.bf16.mxu1 %v2146_v58 }
 0x24f   : > { %3659 = vmatpush3.bf16.msra.mxu0 %v4221_v57 }
 0x250   : > { %3681 = vmatpush3.bf16.msra.mxu1 %v4222_v59  ;;  %3660 = vmatprep.subr.bf16.mxu0 %v4223_v60 }
 0x251   : > { %3682 = vmatprep.subr.bf16.mxu1 %v4224_v61 }
 0x253   : > { %3661 = vmatpush3.bf16.msra.mxu0 %v4225_v62 }
 0x254   : > { %3683 = vmatpush3.bf16.msra.mxu1 %v4226_v63  ;;  %3662 = vmatprep.subr.bf16.mxu0 %v4227_v0 }
 0x255   : > { %3684 = vmatprep.subr.bf16.mxu1 %v4228_v1 }
 0x257   : > { %3663 = vmatpush3.bf16.msra.mxu0 %v4229_v2 }
 0x258   : > { %3685 = vmatpush3.bf16.msra.mxu1 %v4230_v3  ;;  %3664 = vmatprep.subr.bf16.mxu0 %v4231_v6 }
 0x259   : > { %3686 = vmatprep.subr.bf16.mxu1 %v4232_v4 }
 0x25b   : > { %3665 = vmatpush3.bf16.msra.mxu0 %v4233_v5 }
 0x25c   : > { %3687 = vmatpush3.bf16.msra.mxu1 %v4234_v8  ;;  %3666 = vmatprep.subr.bf16.mxu0 %v4235_v35 }
 0x25d   : > { %3688 = vmatprep.subr.bf16.mxu1 %v4236_v14 }
 0x25f   : > { %3667 = vmatpush3.bf16.msra.mxu0 %v4237_v9 }
 0x260   : > { %3689 = vmatpush3.bf16.msra.mxu1 %v4238_v33  ;;  %3668 = vmatprep.subr.bf16.mxu0 %v4239_v50 }
 0x261   : > { %3690 = vmatprep.subr.bf16.mxu1 %v4240_v10 }
 0x263   : > { %3669 = vmatpush3.bf16.msra.mxu0 %v4241_v11 }
 0x264   : > { %3691 = vmatpush3.bf16.msra.mxu1 %v4242_v12  ;;  %3670 = vmatprep.subr.bf16.mxu0 %v4243_v15 }
 0x265   : > { %3692 = vmatprep.subr.bf16.mxu1 %v4244_v16 }
 0x267   : > { %3671 = vmatpush3.bf16.msra.mxu0 %v4245_v18 }
 0x268   : > { %3693 = vmatpush3.bf16.msra.mxu1 %v4246_v19  ;;  %3727 = vmatprep.subr.bf16.mxu0 %v4465_v27 }
 0x269   : > { %3747 = vmatprep.subr.bf16.mxu1 %v4465_v27 }
 0x26a   : > { %2776 = vmatmul.mubr.bf16.vlgmr.msra.gmra.mxu0 %v2143_v24 }
 0x26b   : > { %2816 = vmatmul.mubr.bf16.vlgmr.msra.gmra.mxu1 %v2145_v25  ;;  %3728 = vmatpush3.bf16.msra.mxu0 %v4247_v26  ;;  %v4255_v25 = vld [vmem:[#allocation8 + $0x78] sm:$0xff]   ;;  %v4256_v26 = vld [vmem:[#allocation8 + $0x70] sm:$0xff]  }
 0x26c   : > { %3729 = vmatprep.subr.bf16.mxu0 %v4465_v27  ;;  %3743 = vmatprep.mubr.msk.bf16.mxu0 %vm4466_vm1, %v4465_v27 }
 0x26d   : > { %3763 = vmatprep.mubr.msk.bf16.mxu1 %vm4466_vm1, %v4465_v27  ;;  %3748 = vmatpush3.bf16.msra.mxu1 %v4255_v25 }
 0x26e   : > { %3749 = vmatprep.subr.bf16.mxu1 %v4465_v27 }
 0x26f   : > { %3730 = vmatpush3.bf16.msra.mxu0 %v4248_v28  ;;  %v4257_v28 = vld [vmem:[#allocation8 + $0x68] sm:$0xff]  }
 0x270   : > { %3731 = vmatprep.subr.bf16.mxu0 %v4465_v27 }
 0x271   : > { %3750 = vmatpush3.bf16.msra.mxu1 %v4256_v26 }
 0x272   : > { %3751 = vmatprep.subr.bf16.mxu1 %v4465_v27 }
 0x273   : > { %3732 = vmatpush3.bf16.msra.mxu0 %v4249_v51  ;;  %v4258_v51 = vld [vmem:[#allocation8 + $0x60] sm:$0xff]  }
 0x274   : > { %3733 = vmatprep.subr.bf16.mxu0 %v4465_v27 }
 0x275   : > { %3752 = vmatpush3.bf16.msra.mxu1 %v4257_v28 }
 0x276   : > { %3753 = vmatprep.subr.bf16.mxu1 %v4465_v27 }
 0x277   : > { %3734 = vmatpush3.bf16.msra.mxu0 %v4250_v7  ;;  %v4259_v7 = vld [vmem:[#allocation8 + $0x58] sm:$0xff]  }
 0x278   : > { %3735 = vmatprep.subr.bf16.mxu0 %v4465_v27 }
 0x279   : > { %3754 = vmatpush3.bf16.msra.mxu1 %v4258_v51 }
 0x27a   : > { %3755 = vmatprep.subr.bf16.mxu1 %v4465_v27 }
 0x27b   : > { %3736 = vmatpush3.bf16.msra.mxu0 %v4251_v29  ;;  %v4260_v29 = vld [vmem:[#allocation8 + $0x50] sm:$0xff]  }
 0x27c   : > { %3737 = vmatprep.subr.bf16.mxu0 %v4465_v27 }
 0x27d   : > { %3756 = vmatpush3.bf16.msra.mxu1 %v4259_v7 }
 0x27e   : > { %3757 = vmatprep.subr.bf16.mxu1 %v4465_v27 }
 0x27f   : > { %3738 = vmatpush3.bf16.msra.mxu0 %v4252_v31  ;;  %v4261_v31 = vld [vmem:[#allocation8 + $0x48] sm:$0xff]  }
 0x280   : > { %3739 = vmatprep.subr.bf16.mxu0 %v4465_v27 }
 0x281   : > { %3758 = vmatpush3.bf16.msra.mxu1 %v4260_v29 }
 0x282   : > { %3759 = vmatprep.subr.bf16.mxu1 %v4465_v27 }
 0x283   : > { %3740 = vmatpush3.bf16.msra.mxu0 %v4253_v32  ;;  %v4262_v32 = vld [vmem:[#allocation8 + $0x40] sm:$0xff]  }
 0x284   : > { %3741 = vmatprep.subr.bf16.mxu0 %v4465_v27 }
 0x285   : > { %3760 = vmatpush3.bf16.msra.mxu1 %v4261_v31 }
 0x286   : > { %3761 = vmatprep.subr.bf16.mxu1 %v4465_v27 }
 0x287   : > { %3742 = vmatpush3.bf16.msra.mxu0 %v4254_v36  ;;  %v2080_v36 = vld [vmem:[%s5069_s5 + $0x4] sm:$0x7] }
 0x288   : > { %3767 = vmatprep.subr.bf16.mxu0 %v4465_v27 }
 0x289   : > { %3762 = vmatpush3.bf16.msra.mxu1 %v4262_v32 }
 0x30a   : > { %v3628_v37 = vpop.f32.mrf.mxu0 }
 0x30b   : > { %v3650_v38 = vpop.f32.mrf.mxu1 }
 0x30c   : > { %v3629_v39 = vpop.f32.mrf.mxu0 }
 0x30d   : > { %v3651_v40 = vpop.f32.mrf.mxu1  ;;  %v3630_v47 = vadd.f32 %v3629_v39, %v3628_v37  ;;  %v2857_v37 = vrot.slane %v2080_v36, %v4900_v17 }
 0x30e   : > { %v3631_v41 = vpop.f32.mrf.mxu0  ;;  %v3652_v49 = vadd.f32 %v3651_v40, %v3650_v38 }
 0x30f   : > { %v3653_v42 = vpop.f32.mrf.mxu1  ;;  %v2698_v48 = vadd.f32 %v3630_v47, %v2278_v46 }
 0x310   : > { %v3632_v43 = vpop.f32.mrf.mxu0 }
 0x311   : > { %v3654_v44 = vpop.f32.mrf.mxu1  ;;  %v2738_v54 = vadd.f32 %v3652_v49, %v2698_v48 }
 0x32a   : > { %v3672_v34 = vpop.f32.mrf.mxu0 }
 0x32b   : > { %v3694_v52 = vpop.f32.mrf.mxu1 }
 0x32c   : > { %v3673_v53 = vpop.f32.mrf.mxu0 }
 0x32d   : > { %v3674_v56 = vadd.f32 %v3673_v53, %v3672_v34  ;;  %v3695_v57 = vpop.f32.mrf.mxu1 }
 0x32e   : > { %v3675_v59 = vpop.f32.mrf.mxu0  ;;  %v3696_v61 = vadd.f32 %v3695_v57, %v3694_v52 }
 0x32f   : > { %v2778_v60 = vadd.f32 %v3674_v56, %v2738_v54  ;;  %v3697_v62 = vpop.f32.mrf.mxu1 }
 0x330   : > { %v3676_v63 = vpop.f32.mrf.mxu0 }
 0x331   : > { %v2818_v0 = vadd.f32 %v3696_v61, %v2778_v60  ;;  %v3698_v1 = vpop.f32.mrf.mxu1 }
 0x333   : > { %v2823_v2 = vmax.f32 %v2818_v0, 0.0  ;;  %v2966_v0 = vrot.slane %v2080_v36, %v4920_v30 }
 0x335   : > { %v2824_v3 = vrot.slane %v2823_v2, 4 }
 0x337   : > { %v2825_v6 = vadd.f32 %v2824_v3, %v2823_v2 }
 0x339   : > { %v2826_v4 = vrot.slane %v2825_v6, 2 }
 0x33b   : > { %v2827_v5 = vadd.f32 %v2826_v4, %v2825_v6 }
 0x33d   : > { %v2828_v8 = vrot.slane %v2827_v5, 1 }
 0x33f   : > { %v2829_v35 = vadd.f32 %v2828_v8, %v2827_v5  ;;  %v4263_v8 = vld [vmem:[#allocation8 + $0xb8] sm:$0xff]  }
 0x341   : > { %v2830_v14 = vmul.f32 0.125, %v2829_v35  ;;  %v4264_v35 = vld [vmem:[#allocation8 + $0xb0] sm:$0xff]  }
 0x343   : > { %v2831_v9 = vsub.f32 %v2823_v2, %v2830_v14  ;;  %v2974_v2 = vrot.slane %v2080_v36, %v4926_v13  ;;  %v4265_v14 = vld [vmem:[#allocation8 + $0xa8] sm:$0xff]  }
 0x345   : > { %v2832_v33 = vmul.f32 %v2831_v9, %v2831_v9  ;;  %v2844_v21 = vmul.f32 %v2843_v55, %v2831_v9  ;;  %v4266_v9 = vld [vmem:[#allocation8 + $0xa0] sm:$0xff]  }
 0x347   : > { %v2833_v50 = vrot.slane %v2832_v33, 4 }
 0x349   : > { %v2834_v10 = vadd.f32 %v2833_v50, %v2832_v33  ;;  %v4267_v33 = vld [vmem:[#allocation8 + $0x98] sm:$0xff]   ;;  %v4268_v50 = vld [vmem:[#allocation8 + $0x90] sm:$0xff]  }
 0x34b   : > { %v2835_v11 = vrot.slane %v2834_v10, 2 }
 0x34d   : > { %v2836_v12 = vadd.f32 %v2835_v11, %v2834_v10  ;;  %v4269_v10 = vld [vmem:[#allocation8 + $0x88] sm:$0xff]   ;;  %v4270_v11 = vld [vmem:[#allocation8 + $0x80] sm:$0xff]  }
 0x34f   : > { %v2837_v15 = vrot.slane %v2836_v12, 1 }
 0x351   : > { %v2838_v16 = vadd.f32 %v2837_v15, %v2836_v12  ;;  %v2081_v12 = vld [vmem:[%s5069_s5 + $0x8] sm:$0x7] }
 0x352   : > { %v2980_v15 = vrot.slane %v2081_v12, %v4900_v17 }
 0x353   : > { %v2839_v18 = vmul.f32 0.125, %v2838_v16 }
 0x355   : > { %v2845_v19 = vadd.f32 1e-05, %v2839_v18 }
 0x357   : > { %4271 = vrsqrt.f32 %v2845_v19 }
 0x364   : > { %v4272_v58 = vpop.eup %4271 }
 0x365   : > { %v2847_v22 = vmul.f32 %v4272_v58, %v2844_v21 }
 0x367   : > { %v2852_v23 = vadd.f32 %v2851_v20, %v2847_v22 }
 0x369   : > { %v2853_v24 = vpack.c.bf16 %v2852_v23, %v2852_v23  ;;  %3192 = vst [vmem:[%s5071_s7] sm:$0xff] %v2852_v23 }
 0x36b   : > { %3744 = vmatmul.mubr.bf16.vlgmr.msra.gmra.mxu0 %v2853_v24 }
 0x36c   : > { %3783 = vmatprep.mubr.msk.bf16.mxu0 %vm4466_vm1, %v4465_v27  ;;  %3768 = vmatpush3.bf16.msra.mxu0 %v4263_v8 }
 0x36d   : > { %3769 = vmatprep.subr.bf16.mxu0 %v4465_v27 }
 0x370   : > { %3770 = vmatpush3.bf16.msra.mxu0 %v4264_v35 }
 0x371   : > { %3771 = vmatprep.subr.bf16.mxu0 %v4465_v27 }
 0x374   : > { %3772 = vmatpush3.bf16.msra.mxu0 %v4265_v14 }
 0x375   : > { %3773 = vmatprep.subr.bf16.mxu0 %v4465_v27 }
 0x378   : > { %3774 = vmatpush3.bf16.msra.mxu0 %v4266_v9 }
 0x379   : > { %3775 = vmatprep.subr.bf16.mxu0 %v4465_v27 }
 0x37c   : > { %3776 = vmatpush3.bf16.msra.mxu0 %v4267_v33 }
 0x37d   : > { %3777 = vmatprep.subr.bf16.mxu0 %v4465_v27 }
 0x380   : > { %3778 = vmatpush3.bf16.msra.mxu0 %v4268_v50 }
 0x381   : > { %3779 = vmatprep.subr.bf16.mxu0 %v4465_v27 }
 0x384   : > { %3780 = vmatpush3.bf16.msra.mxu0 %v4269_v10 }
 0x385   : > { %3781 = vmatprep.subr.bf16.mxu0 %v4465_v27 }
 0x388   : > { %3782 = vmatpush3.bf16.msra.mxu0 %v4270_v11 }
 0x42b   : > { %v2940_v38 = vpop.f32.mrf.mxu0 }
 0x42c   : > { %v2941_v39 = vadd.f32 %v2940_v38, %v2857_v37 }
 0x42d   : > { %v3745_v40 = vpop.f32.mrf.mxu0 }
 0x42e   : > { %v2946_v41 = vmax.f32 %v2941_v39, 0.0  ;;  %v3089_v40 = vrot.slane %v2081_v12, %v4920_v30 }
 0x42f   : > { %v2943_v42 = vpop.f32.mrf.mxu0 }
 0x430   : > { %v2947_v43 = vrot.slane %v2946_v41, 4  ;;  %v3097_v42 = vrot.slane %v2081_v12, %v4926_v13 }
 0x431   : > { %v3746_v44 = vpop.f32.mrf.mxu0 }
 0x432   : > { %v2948_v45 = vadd.f32 %v2947_v43, %v2946_v41 }
 0x434   : > { %v2949_v46 = vrot.slane %v2948_v45, 2 }
 0x436   : > { %v2950_v47 = vadd.f32 %v2949_v46, %v2948_v45 }
 0x438   : > { %v2951_v48 = vrot.slane %v2950_v47, 1 }
 0x43a   : > { %v2952_v49 = vadd.f32 %v2951_v48, %v2950_v47  ;;  %v2082_v47 = vld [vmem:[%s5069_s5 + $0xc] sm:$0x7] }
 0x43b   : > { %v3103_v48 = vrot.slane %v2082_v47, %v4900_v17 }
 0x43c   : > { %v2953_v34 = vmul.f32 0.125, %v2952_v49 }
 0x43e   : > { %v2954_v52 = vsub.f32 %v2946_v41, %v2953_v34 }
 0x440   : > { %v2955_v53 = vmul.f32 %v2954_v52, %v2954_v52  ;;  %v2967_v1 = vmul.f32 %v2966_v0, %v2954_v52 }
 0x442   : > { %v2956_v54 = vrot.slane %v2955_v53, 4 }
 0x444   : > { %v2957_v56 = vadd.f32 %v2956_v54, %v2955_v53 }
 0x446   : > { %v2958_v57 = vrot.slane %v2957_v56, 2 }
 0x448   : > { %v2959_v59 = vadd.f32 %v2958_v57, %v2957_v56 }
 0x44a   : > { %v2960_v60 = vrot.slane %v2959_v59, 1 }
 0x44c   : > { %v2961_v61 = vadd.f32 %v2960_v60, %v2959_v59 }
 0x44e   : > { %v2962_v62 = vmul.f32 0.125, %v2961_v61 }
 0x450   : > { %v2968_v63 = vadd.f32 1e-05, %v2962_v62 }
 0x452   : > { %4273 = vrsqrt.f32 %v2968_v63 }
 0x45f   : > { %v4274_v3 = vpop.eup %4273 }
 0x460   : > { %v2970_v6 = vmul.f32 %v4274_v3, %v2967_v1 }
 0x462   : > { %v2975_v4 = vadd.f32 %v2974_v2, %v2970_v6 }
 0x464   : > { %3604 = vst [vmem:[%s5071_s7 + $0x8] sm:$0xff] %v2975_v4  ;;  %v2976_v5 = vpack.c.bf16 %v2975_v4, %v2975_v4 }
 0x466   : > { %3764 = vmatmul.mubr.bf16.vlgmr.msra.gmra.mxu1 %v2976_v5 }
 0x526   : > { %v3063_v16 = vpop.f32.mrf.mxu1 }
 0x527   : > { %v3064_v18 = vadd.f32 %v3063_v16, %v2980_v15 }
 0x528   : > { %v3765_v19 = vpop.f32.mrf.mxu1 }
 0x529   : > { %v3069_v55 = vmax.f32 %v3064_v18, 0.0 }
 0x52a   : > { %v3066_v20 = vpop.f32.mrf.mxu1 }
 0x52b   : > { %v3070_v21 = vrot.slane %v3069_v55, 4 }
 0x52c   : > { %v3766_v58 = vpop.f32.mrf.mxu1 }
 0x52d   : > { %v3071_v22 = vadd.f32 %v3070_v21, %v3069_v55 }
 0x52f   : > { %v3072_v23 = vrot.slane %v3071_v22, 2 }
 0x531   : > { %v3073_v24 = vadd.f32 %v3072_v23, %v3071_v22 }
 0x533   : > { %v3074_v25 = vrot.slane %v3073_v24, 1 }
 0x535   : > { %v3075_v27 = vadd.f32 %v3074_v25, %v3073_v24 }
 0x537   : > { %v3076_v26 = vmul.f32 0.125, %v3075_v27 }
 0x539   : > { %v3077_v28 = vsub.f32 %v3069_v55, %v3076_v26 }
 0x53b   : > { %v3078_v51 = vmul.f32 %v3077_v28, %v3077_v28  ;;  %v3090_v41 = vmul.f32 %v3089_v40, %v3077_v28 }
 0x53d   : > { %v3079_v7 = vrot.slane %v3078_v51, 4 }
 0x53f   : > { %v3080_v29 = vadd.f32 %v3079_v7, %v3078_v51 }
 0x541   : > { %v3081_v31 = vrot.slane %v3080_v29, 2 }
 0x543   : > { %v3082_v32 = vadd.f32 %v3081_v31, %v3080_v29 }
 0x545   : > { %v3083_v36 = vrot.slane %v3082_v32, 1 }
 0x547   : > { %v3084_v37 = vadd.f32 %v3083_v36, %v3082_v32 }
 0x549   : > { %v3085_v38 = vmul.f32 0.125, %v3084_v37 }
 0x54b   : > { %v3091_v39 = vadd.f32 1e-05, %v3085_v38 }
 0x54d   : > { %4275 = vrsqrt.f32 %v3091_v39 }
 0x55a   : > { %v4276_v43 = vpop.eup %4275 }
 0x55b   : > { %v3093_v44 = vmul.f32 %v4276_v43, %v3090_v41 }
 0x55d   : > { %v3098_v45 = vadd.f32 %v3097_v42, %v3093_v44 }
 0x55f   : > { %3605 = vst [vmem:[%s5071_s7 + $0x10] sm:$0xff] %v3098_v45  ;;  %v3099_v46 = vpack.c.bf16 %v3098_v45, %v3098_v45 }
 0x561   : > { %3784 = vmatmul.mubr.bf16.vlgmr.msra.gmra.mxu0 %v3099_v46 }
 0x621   : > { %v3186_v49 = vpop.f32.mrf.mxu0 }
 0x622   : > { %v3187_v30 = vadd.f32 %v3186_v49, %v3103_v48 }
 0x623   : > { %v3785_v34 = vpop.f32.mrf.mxu0 }
 0x624   : > { %3606 = vst [vmem:[%s5071_s7 + $0x18] sm:$0xff] %v3187_v30 }
 0x625   : > { %v3189_v13 = vpop.f32.mrf.mxu0 }
 0x627   : > { %v3786_v52 = vpop.f32.mrf.mxu0 }
 0x628 PF: > { %p3828_p9 = scmp.eq.s32.totalorder %s4527_s28, 1  ;;  %s4467_s21 = smov [#allocation10]  }
 0x629   : > { %s3206_s2 = sshll.u32 %s4467_s21, 4  ;;  %s3207_s2 = int_to_ptr.vmem [resolvable:$true] %s3206_s2 }
 0x62a   : > { %s4383_s22 = scalar_lea.vmem %s3207_s2, 1024  ;;  %p4390_p7 = scmp.lt.s32.totalorder %s3207_s2, %s3207_s2 }
 0x62b   : > { %p4384_p13 = scmp.ne.s32.totalorder %s3207_s2, %s4383_s22  ;;  %p4391_p0 = scmp.lt.s32.totalorder %s4383_s22, %s4383_s22 }
 0x62d   : > { %p4385_p3 = pnand %p4384_p13, %p3828_p9  ;;  %p4392_p12 = por %p4391_p0, %p4390_p7 }
 0x62f   : > { %p4386_p6 = pneg %p4385_p3 }
 0x631   : > { %p4393_p4 = pnand %p4392_p12, %p4386_p6 }
 0x633   : > { %4396 = shalt.err (!%p4393_p4)
}
 0x634   : > { %3804 = dma.vmem_to_hbm [thread:$0]  (%p3828_p9), %s3207_s2, 1024, %s5070_s6, [#allocation4]  }
 0x635   : > { %4436 = dma.done.wait (%p3828_p9), [#allocation4], 1024  }
 0x636   : > { %4438 = vsyncadd (%p3828_p9), [#allocation4], 4294966272 }
 0x637 PF: > { %p21_p11 = scmp.ge.s32.totalorder %s4530_s29, 4   ;;  %s5090_s24 = smov %s4445_s25 }
 0x638   : > { %s5091_s25 = smov %s4449_s26  ;;  %s5092_s26 = smov %s4540_s9 }
 0x639   : > { %s5093_s27 = smov %s4530_s29  ;;  %23 = sbr.rel (!%p21_p11) target bundleno = 8 (0x8), region = 110 }
 0x63e   :  { %3225 = vsyncpa [#allocation3], 1 }
 0x63f   :  { %3227 = vsyncpa [#allocation3 + $0x1], 1 }
 0x640   :  { %3228 = vsyncpa [#allocation6], 1 }
 0x641   :  { %3229 = vsyncpa [#allocation9], 1 }
 0x642   :  { %3230 = vsyncpa [#allocation4], 1 }
 0x643   :  { %3232 = vsyncpa [#allocation4 + $0x1], 1 }

</bundles_post_ra>
